<compile_context>
chip_gen: v5e
topology: v5e:2x2
jax: 0.10.0
libtpu: 0.0.40
codegen_flags: <defaults>
</compile_context>

<pallas_src>
import math
import functools

import jax
import jax.numpy as jnp
from jax import lax
from jax.experimental import pallas as pl
from jax.experimental.pallas import tpu as pltpu


def _transformer_bc_kernel(
        ts_ref,                      # (R, 1)  int32 timesteps for this row slab
        src_ref,                     # (R, D_src)
        mask_ref,                    # (R, R)  block-diagonal additive attention mask
        w_emb_ref, b_emb_ref,        # (D_src, E), (1, E)   [sqrt(E) pre-folded]
        pos_ref,                     # (MAX_LEN, E)
        w_in_ref, b_in_ref,          # (L, E, 3E), (L, 1, 3E)  [Q cols pre-scaled by 1/sqrt(hd)]
        w_out_ref, b_out_ref,        # (L, E, E), (L, 1, E)
        ln1g_ref, ln1b_ref,          # (L, 1, E)
        w_ff1_ref, b_ff1_ref,        # (L, E, DFF), (L, 1, DFF)
        w_ff2_ref, b_ff2_ref,        # (L, DFF, E), (L, 1, E)
        ln2g_ref, ln2b_ref,          # (L, 1, E)
        lnfg_ref, lnfb_ref,          # (1, E)   final encoder LayerNorm
        w_gen_ref, b_gen_ref,        # (E, DPAD), (1, DPAD)   lane-padded generator
        out_ref,                     # (R, DPAD)
        *, num_heads):
    R = src_ref.shape[0]
    E = w_emb_ref.shape[1]
    L = w_in_ref.shape[0]
    MAX_LEN = pos_ref.shape[0]
    nh = num_heads
    hd = E // nh
    f32 = jnp.float32

    def mm(a, w):
        return jnp.dot(a, w, preferred_element_type=f32)

    def layer_norm(y, g, beta):
        mu = jnp.mean(y, axis=-1, keepdims=True)
        yc = y - mu
        var = jnp.mean(yc * yc, axis=-1, keepdims=True)
        return yc * lax.rsqrt(var + 1e-5) * g + beta

    # --- LinTokenEmbedding (sqrt(E) folded into weights host-side) ---
    x = mm(src_ref[...], w_emb_ref[...]) + b_emb_ref[...]          # (R, E)

    # --- SimplePositionalEncoding via one-hot matmul (no dynamic gather) ---
    ts = ts_ref[...]                                               # (R, 1) int32
    iota = lax.broadcasted_iota(jnp.int32, (R, MAX_LEN), 1)
    onehot = (iota == ts).astype(f32)                              # (R, MAX_LEN)
    x = x + mm(onehot, pos_ref[...])

    mask = mask_ref[...]                                           # (R, R)

    # --- post-norm TransformerEncoder layers (dropout = identity at inference) ---
    for l in range(L):
        qkv = mm(x, w_in_ref[l]) + b_in_ref[l]                     # (R, 3E)
        wo = w_out_ref[l]                                          # (E, E)
        attn = jnp.zeros((R, E), f32)
        for h in range(nh):
            q_h = qkv[:, h * hd:(h + 1) * hd]                      # already /sqrt(hd)
            k_h = qkv[:, E + h * hd:E + (h + 1) * hd]
            v_h = qkv[:, 2 * E + h * hd:2 * E + (h + 1) * hd]
            scores = lax.dot_general(q_h, k_h, (((1,), (1,)), ((), ())),
                                     preferred_element_type=f32) + mask
            scores = scores - jnp.max(scores, axis=-1, keepdims=True)
            e = jnp.exp(scores)
            p = e * pl.reciprocal(jnp.sum(e, axis=-1, keepdims=True), approx=True)
            ctx = mm(p, v_h)                                       # (R, hd)
            # fold per-head output into the out-projection (sublane slice, no lane concat)
            attn = attn + mm(ctx, wo[h * hd:(h + 1) * hd, :])      # (R, E)
        attn = attn + b_out_ref[l]
        x = layer_norm(x + attn, ln1g_ref[l], ln1b_ref[l])

        ffh = jnp.maximum(mm(x, w_ff1_ref[l]) + b_ff1_ref[l], 0.0)            # relu
        x = layer_norm(x + mm(ffh, w_ff2_ref[l]) + b_ff2_ref[l],
                       ln2g_ref[l], ln2b_ref[l])

    # --- final encoder LayerNorm (added by nn.Transformer) ---
    x = layer_norm(x, lnfg_ref[...], lnfb_ref[...])

    # --- generator: Linear + Sigmoid (lane-padded -> dense stores) ---
    out_ref[...] = jax.nn.sigmoid(mm(x, w_gen_ref[...]) + b_gen_ref[...])


def _pick_batch_tile(B, S, max_rows=256):
    """Largest divisor Bt of B with Bt*S <= max_rows and a clean sublane tiling."""
    bt = 1
    for cand in range(1, B + 1):
        if B % cand:
            continue
        rows = cand * S
        if rows > max_rows:
            break
        if cand != B and rows % 8 != 0:
            continue
        bt = cand
    return bt


def pack_params(params, nhead, lane_pad=128):
    """One-time host-side transform of logical (PyTorch-layout) params into kernel params."""
    E = params["w_src_emb_t"].shape[1]
    hd = E // nhead
    D_tgt = params["w_gen_t"].shape[1]
    dpad = ((D_tgt + lane_pad - 1) // lane_pad) * lane_pad

    p = dict(params)
    se = jnp.float32(math.sqrt(E))
    p["w_src_emb_t"] = params["w_src_emb_t"] * se
    p["b_src_emb"] = params["b_src_emb"] * se

    qscale = jnp.concatenate([jnp.full((E,), 1.0 / math.sqrt(hd), jnp.float32),
                              jnp.ones((2 * E,), jnp.float32)])
    p["w_in_t"] = params["w_in_t"] * qscale[None, None, :]
    p["b_in"] = params["b_in"] * qscale[None, None, :]

    p["w_gen_t"] = jnp.zeros((E, dpad), jnp.float32).at[:, :D_tgt].set(params["w_gen_t"])
    p["b_gen"] = jnp.zeros((1, dpad), jnp.float32).at[:, :D_tgt].set(params["b_gen"])
    return p


def mySeq2SeqTransformer_bc_forward(packed, src, trg, src_mask, tgt_mask,
                                    src_padding_mask, tgt_padding_mask,
                                    memory_key_padding_mask, timesteps, *, nhead):
    """Matches the PyTorch forward: only src / src_mask / timesteps affect the output.

    src:       (B, S, src_vec_dim) float
    trg:       (B, S, tgt_vec_dim) (only its last dim is used, to size the output)
    timesteps: (B, S) int (< max_len)
    src_mask:  (S, S) additive float attention mask
    returns:   (B, S, tgt_vec_dim) in (0, 1)
    """
    del tgt_mask, src_padding_mask, tgt_padding_mask, memory_key_padding_mask  # unused

    B, S, D_src = src.shape
    D_tgt = trg.shape[-1]
    E = packed["w_src_emb_t"].shape[1]
    L = packed["w_in_t"].shape[0]
    DFF = packed["w_ff1_t"].shape[2]
    MAX_LEN = packed["pos_table"].shape[0]
    DPAD = packed["w_gen_t"].shape[1]
    assert E % nhead == 0

    # Fold batch elements into each grid step so matmul sublanes are filled.
    bt = _pick_batch_tile(B, S)
    nblk = B // bt
    R = bt * S

    src2d = src.astype(jnp.float32).reshape(B * S, D_src)
    ts2d = timesteps.astype(jnp.int32).reshape(B * S, 1)

    # Block-diagonal additive mask: src_mask within a sample, -1e9 across samples.
    sample_id = jnp.arange(R, dtype=jnp.int32) // S
    same = sample_id[:, None] == sample_id[None, :]
    mask_full = jnp.where(same, jnp.tile(src_mask.astype(jnp.float32), (bt, bt)),
                          jnp.float32(-1e9))

    blk2 = lambda i: (i, 0)      # per-grid-block row slab
    const2 = lambda i: (0, 0)    # VMEM-resident weights
    const3 = lambda i: (0, 0, 0)

    in_specs = [
        pl.BlockSpec((R, 1), blk2),                 # timesteps
        pl.BlockSpec((R, D_src), blk2),             # src rows
        pl.BlockSpec((R, R), const2),               # block-diagonal mask
        pl.BlockSpec((D_src, E), const2),           # w_src_emb_t (pre-scaled)
        pl.BlockSpec((1, E), const2),               # b_src_emb  (pre-scaled)
        pl.BlockSpec((MAX_LEN, E), const2),         # pos_table
        pl.BlockSpec((L, E, 3 * E), const3),        # w_in_t (fused QKV, Q pre-scaled)
        pl.BlockSpec((L, 1, 3 * E), const3),        # b_in
        pl.BlockSpec((L, E, E), const3),            # w_out_t
        pl.BlockSpec((L, 1, E), const3),            # b_out
        pl.BlockSpec((L, 1, E), const3),            # ln1_g
        pl.BlockSpec((L, 1, E), const3),            # ln1_b
        pl.BlockSpec((L, E, DFF), const3),          # w_ff1_t
        pl.BlockSpec((L, 1, DFF), const3),          # b_ff1
        pl.BlockSpec((L, DFF, E), const3),          # w_ff2_t
        pl.BlockSpec((L, 1, E), const3),            # b_ff2
        pl.BlockSpec((L, 1, E), const3),            # ln2_g
        pl.BlockSpec((L, 1, E), const3),            # ln2_b
        pl.BlockSpec((1, E), const2),               # lnf_g
        pl.BlockSpec((1, E), const2),               # lnf_b
        pl.BlockSpec((E, DPAD), const2),            # w_gen_t (lane-padded)
        pl.BlockSpec((1, DPAD), const2),            # b_gen   (lane-padded)
    ]

    kernel = functools.partial(_transformer_bc_kernel, num_heads=nhead)

    out = pl.pallas_call(
        kernel,
        grid=(nblk,),
        in_specs=in_specs,
        out_specs=pl.BlockSpec((R, DPAD), blk2),
        out_shape=jax.ShapeDtypeStruct((B * S, DPAD), jnp.float32),
        compiler_params=pltpu.CompilerParams(
            dimension_semantics=("parallel",),
            vmem_limit_bytes=32 * 1024 * 1024),
    )(ts2d, src2d, mask_full,
      packed["w_src_emb_t"], packed["b_src_emb"], packed["pos_table"],
      packed["w_in_t"], packed["b_in"], packed["w_out_t"], packed["b_out"],
      packed["ln1_g"], packed["ln1_b"],
      packed["w_ff1_t"], packed["b_ff1"], packed["w_ff2_t"], packed["b_ff2"],
      packed["ln2_g"], packed["ln2_b"],
      packed["lnf_g"], packed["lnf_b"],
      packed["w_gen_t"], packed["b_gen"])

    return out.reshape(B, S, DPAD)[..., :D_tgt]


def init_params(key, *, num_layers, emb_size, nhead, src_vec_dim, tgt_vec_dim,
                dim_feedforward, max_len):
    """Deterministic synthetic parameters in logical (x @ W) layout, PyTorch semantics."""
    del nhead
    E, L, DFF = emb_size, num_layers, dim_feedforward
    ks = iter(jax.random.split(key, 20))

    def unif(k, shape, fan_in):
        bnd = 1.0 / math.sqrt(fan_in)
        return jax.random.uniform(k, shape, jnp.float32, -bnd, bnd)

    p = {}
    p["w_src_emb_t"] = unif(next(ks), (src_vec_dim, E), src_vec_dim)
    p["b_src_emb"] = unif(next(ks), (1, E), src_vec_dim)
    p["pos_table"] = 0.1 * jax.random.normal(next(ks), (max_len, E), jnp.float32)
    p["w_in_t"] = unif(next(ks), (L, E, 3 * E), E)
    p["b_in"] = unif(next(ks), (L, 1, 3 * E), E)
    p["w_out_t"] = unif(next(ks), (L, E, E), E)
    p["b_out"] = unif(next(ks), (L, 1, E), E)
    p["ln1_g"] = 1.0 + 0.05 * jax.random.normal(next(ks), (L, 1, E), jnp.float32)
    p["ln1_b"] = 0.05 * jax.random.normal(next(ks), (L, 1, E), jnp.float32)
    p["w_ff1_t"] = unif(next(ks), (L, E, DFF), E)
    p["b_ff1"] = unif(next(ks), (L, 1, DFF), E)
    p["w_ff2_t"] = unif(next(ks), (L, DFF, E), DFF)
    p["b_ff2"] = unif(next(ks), (L, 1, E), DFF)
    p["ln2_g"] = 1.0 + 0.05 * jax.random.normal(next(ks), (L, 1, E), jnp.float32)
    p["ln2_b"] = 0.05 * jax.random.normal(next(ks), (L, 1, E), jnp.float32)
    p["lnf_g"] = 1.0 + 0.05 * jax.random.normal(next(ks), (1, E), jnp.float32)
    p["lnf_b"] = 0.05 * jax.random.normal(next(ks), (1, E), jnp.float32)
    p["w_gen_t"] = unif(next(ks), (E, tgt_vec_dim), E)
    p["b_gen"] = unif(next(ks), (1, tgt_vec_dim), E)
    return p


def reference_forward(src, timesteps, src_mask, params, nhead):
    """Pure-JAX reference of the PyTorch forward (logical, unfolded params)."""
    E = params["w_src_emb_t"].shape[1]
    hd = E // nhead
    L = params["w_in_t"].shape[0]

    def ln(y, g, beta):
        mu = jnp.mean(y, axis=-1, keepdims=True)
        yc = y - mu
        var = jnp.mean(yc * yc, axis=-1, keepdims=True)
        return yc * lax.rsqrt(var + 1e-5) * g + beta

    x = jnp.einsum("bsd,de->bse", src.astype(jnp.float32),
                   params["w_src_emb_t"]) + params["b_src_emb"]
    x = x * math.sqrt(E)
    x = x + params["pos_table"][timesteps]
    B, S, _ = x.shape

    for l in range(L):
        qkv = jnp.einsum("bse,ef->bsf", x, params["w_in_t"][l]) + params["b_in"][l]
        q, k, v = qkv[..., :E], qkv[..., E:2 * E], qkv[..., 2 * E:]
        qh = q.reshape(B, S, nhead, hd).transpose(0, 2, 1, 3)
        kh = k.reshape(B, S, nhead, hd).transpose(0, 2, 1, 3)
        vh = v.reshape(B, S, nhead, hd).transpose(0, 2, 1, 3)
        scores = jnp.einsum("bhqd,bhkd->bhqk", qh, kh) / math.sqrt(hd) + src_mask
        p = jax.nn.softmax(scores, axis=-1)
        attn = jnp.einsum("bhqk,bhkd->bhqd", p, vh).transpose(0, 2, 1, 3).reshape(B, S, E)
        attn = jnp.einsum("bse,ef->bsf", attn, params["w_out_t"][l]) + params["b_out"][l]
        x = ln(x + attn, params["ln1_g"][l], params["ln1_b"][l])
        h = jax.nn.relu(jnp.einsum("bse,ef->bsf", x, params["w_ff1_t"][l]) + params["b_ff1"][l])
        ffo = jnp.einsum("bsf,fe->bse", h, params["w_ff2_t"][l]) + params["b_ff2"][l]
        x = ln(x + ffo, params["ln2_g"][l], params["ln2_b"][l])

    x = ln(x, params["lnf_g"], params["lnf_b"])
    return jax.nn.sigmoid(jnp.einsum("bse,et->bst", x, params["w_gen_t"]) + params["b_gen"])


if __name__ == "__main__":
    NUM_LAYERS = 2
    EMB = 32
    NHEAD = 4
    SRC_DIM = 6
    TGT_DIM = 4
    DFF = NHEAD * EMB        # dim_feedforward default = nhead * emb_size
    MAX_LEN = 120
    B, S = 2, 8

    key = jax.random.PRNGKey(0)
    k_p, k_src, k_trg = jax.random.split(key, 3)

    params = init_params(k_p, num_layers=NUM_LAYERS, emb_size=EMB, nhead=NHEAD,
                         src_vec_dim=SRC_DIM, tgt_vec_dim=TGT_DIM,
                         dim_feedforward=DFF, max_len=MAX_LEN)
    packed = pack_params(params, NHEAD)          # one-time transform for the kernel

    src = jax.random.normal(k_src, (B, S, SRC_DIM), jnp.float32)
    trg = jax.random.normal(k_trg, (B, S, TGT_DIM), jnp.float32)   # unused by the output values
    timesteps = jnp.tile(jnp.arange(S, dtype=jnp.int32)[None, :], (B, 1))
    src_mask = jnp.zeros((S, S), jnp.float32)                      # additive attn mask
    tgt_mask = jnp.zeros((S, S), jnp.float32)
    src_pad = jnp.zeros((B, S), jnp.bool_)
    tgt_pad = jnp.zeros((B, S), jnp.bool_)

    out = mySeq2SeqTransformer_bc_forward(
        packed, src, trg, src_mask, tgt_mask, src_pad, tgt_pad, src_pad,
        timesteps, nhead=NHEAD)
    out = jax.block_until_ready(out)

    ref = jax.block_until_ready(reference_forward(src, timesteps, src_mask, params, NHEAD))

    assert out.shape == (B, S, TGT_DIM)
    max_err = float(jnp.max(jnp.abs(out - ref)))
    assert jnp.allclose(out, ref, atol=2e-2, rtol=2e-2), f"max_err={max_err}"
    assert bool(jnp.all((out >= 0.0) & (out <= 1.0)))   # sigmoid range sanity check

    print("KERNEL_OK")
</pallas_src>

<mosaic_0001>
module attributes {stable_mosaic.version = 11 : i64} {
  func.func @_transformer_bc_kernel(%arg0: i32, %arg1: memref<16x1xi32, #tpu.memory_space<vmem>>, %arg2: memref<16x6xf32, #tpu.memory_space<vmem>>, %arg3: memref<16x16xf32, #tpu.memory_space<vmem>>, %arg4: memref<6x32xf32, #tpu.memory_space<vmem>>, %arg5: memref<1x32xf32, #tpu.memory_space<vmem>>, %arg6: memref<120x32xf32, #tpu.memory_space<vmem>>, %arg7: memref<2x32x96xf32, #tpu.memory_space<vmem>>, %arg8: memref<2x1x96xf32, #tpu.memory_space<vmem>>, %arg9: memref<2x32x32xf32, #tpu.memory_space<vmem>>, %arg10: memref<2x1x32xf32, #tpu.memory_space<vmem>>, %arg11: memref<2x1x32xf32, #tpu.memory_space<vmem>>, %arg12: memref<2x1x32xf32, #tpu.memory_space<vmem>>, %arg13: memref<2x32x128xf32, #tpu.memory_space<vmem>>, %arg14: memref<2x1x128xf32, #tpu.memory_space<vmem>>, %arg15: memref<2x128x32xf32, #tpu.memory_space<vmem>>, %arg16: memref<2x1x32xf32, #tpu.memory_space<vmem>>, %arg17: memref<2x1x32xf32, #tpu.memory_space<vmem>>, %arg18: memref<2x1x32xf32, #tpu.memory_space<vmem>>, %arg19: memref<1x32xf32, #tpu.memory_space<vmem>>, %arg20: memref<1x32xf32, #tpu.memory_space<vmem>>, %arg21: memref<32x128xf32, #tpu.memory_space<vmem>>, %arg22: memref<1x128xf32, #tpu.memory_space<vmem>>, %arg23: memref<16x128xf32, #tpu.memory_space<vmem>>) attributes {dimension_semantics = [#tpu.dimension_semantics<parallel>], iteration_bounds = array<i64: 1>, scalar_prefetch = 0 : i64, scratch_operands = 0 : i64, tpu.core_type = #tpu.core_type<tc>, window_params = [{transform_indices = @transform_0, window_bounds = array<i64: 16, 1>}, {transform_indices = @transform_1, window_bounds = array<i64: 16, 6>}, {pipeline_mode = #tpu.pipeline_mode<synchronous>, transform_indices = @transform_2, window_bounds = array<i64: 16, 16>}, {pipeline_mode = #tpu.pipeline_mode<synchronous>, transform_indices = @transform_3, window_bounds = array<i64: 6, 32>}, {pipeline_mode = #tpu.pipeline_mode<synchronous>, transform_indices = @transform_4, window_bounds = array<i64: 1, 32>}, {pipeline_mode = #tpu.pipeline_mode<synchronous>, transform_indices = @transform_5, window_bounds = array<i64: 120, 32>}, {pipeline_mode = #tpu.pipeline_mode<synchronous>, transform_indices = @transform_6, window_bounds = array<i64: 2, 32, 96>}, {pipeline_mode = #tpu.pipeline_mode<synchronous>, transform_indices = @transform_7, window_bounds = array<i64: 2, 1, 96>}, {pipeline_mode = #tpu.pipeline_mode<synchronous>, transform_indices = @transform_8, window_bounds = array<i64: 2, 32, 32>}, {pipeline_mode = #tpu.pipeline_mode<synchronous>, transform_indices = @transform_9, window_bounds = array<i64: 2, 1, 32>}, {pipeline_mode = #tpu.pipeline_mode<synchronous>, transform_indices = @transform_10, window_bounds = array<i64: 2, 1, 32>}, {pipeline_mode = #tpu.pipeline_mode<synchronous>, transform_indices = @transform_11, window_bounds = array<i64: 2, 1, 32>}, {pipeline_mode = #tpu.pipeline_mode<synchronous>, transform_indices = @transform_12, window_bounds = array<i64: 2, 32, 128>}, {pipeline_mode = #tpu.pipeline_mode<synchronous>, transform_indices = @transform_13, window_bounds = array<i64: 2, 1, 128>}, {pipeline_mode = #tpu.pipeline_mode<synchronous>, transform_indices = @transform_14, window_bounds = array<i64: 2, 128, 32>}, {pipeline_mode = #tpu.pipeline_mode<synchronous>, transform_indices = @transform_15, window_bounds = array<i64: 2, 1, 32>}, {pipeline_mode = #tpu.pipeline_mode<synchronous>, transform_indices = @transform_16, window_bounds = array<i64: 2, 1, 32>}, {pipeline_mode = #tpu.pipeline_mode<synchronous>, transform_indices = @transform_17, window_bounds = array<i64: 2, 1, 32>}, {pipeline_mode = #tpu.pipeline_mode<synchronous>, transform_indices = @transform_18, window_bounds = array<i64: 1, 32>}, {pipeline_mode = #tpu.pipeline_mode<synchronous>, transform_indices = @transform_19, window_bounds = array<i64: 1, 32>}, {pipeline_mode = #tpu.pipeline_mode<synchronous>, transform_indices = @transform_20, window_bounds = array<i64: 32, 128>}, {pipeline_mode = #tpu.pipeline_mode<synchronous>, transform_indices = @transform_21, window_bounds = array<i64: 1, 128>}, {transform_indices = @transform_22, window_bounds = array<i64: 16, 128>}]} {
    %c0 = arith.constant 0 : index
    %c0_0 = arith.constant 0 : index
    %0 = vector.load %arg2[%c0, %c0_0] : memref<16x6xf32, #tpu.memory_space<vmem>>, vector<16x6xf32>
    %c0_1 = arith.constant 0 : index
    %c0_2 = arith.constant 0 : index
    %1 = vector.load %arg4[%c0_1, %c0_2] : memref<6x32xf32, #tpu.memory_space<vmem>>, vector<6x32xf32>
    %cst = arith.constant dense<0.000000e+00> : vector<16x32xf32>
    %2 = tpu.matmul %0, %1, %cst {dimension_numbers = #tpu.dot_dimension_numbers<[1], [0], [0], [1], [0, 0, 1, 1], [], []>} : vector<16x6xf32>, vector<6x32xf32>, vector<16x32xf32> -> vector<16x32xf32>
    %c0_3 = arith.constant 0 : index
    %c0_4 = arith.constant 0 : index
    %3 = vector.load %arg5[%c0_3, %c0_4] : memref<1x32xf32, #tpu.memory_space<vmem>>, vector<1x32xf32>
    %4 = vector.broadcast %3 : vector<1x32xf32> to vector<16x32xf32>
    %5 = arith.addf %2, %4 : vector<16x32xf32>
    %c0_5 = arith.constant 0 : index
    %c0_6 = arith.constant 0 : index
    %6 = vector.load %arg1[%c0_5, %c0_6] : memref<16x1xi32, #tpu.memory_space<vmem>>, vector<16x1xi32>
    %7 = tpu.iota {dimensions = array<i32: 1>} : vector<16x120xi32>
    %8 = vector.broadcast %6 : vector<16x1xi32> to vector<16x120xi32>
    %9 = arith.cmpi eq, %7, %8 : vector<16x120xi32>
    %10 = arith.extui %9 : vector<16x120xi1> to vector<16x120xi32>
    %11 = arith.sitofp %10 : vector<16x120xi32> to vector<16x120xf32>
    %c0_7 = arith.constant 0 : index
    %c0_8 = arith.constant 0 : index
    %12 = vector.load %arg6[%c0_7, %c0_8] : memref<120x32xf32, #tpu.memory_space<vmem>>, vector<120x32xf32>
    %cst_9 = arith.constant dense<0.000000e+00> : vector<16x32xf32>
    %13 = tpu.matmul %11, %12, %cst_9 {dimension_numbers = #tpu.dot_dimension_numbers<[1], [0], [0], [1], [0, 0, 1, 1], [], []>} : vector<16x120xf32>, vector<120x32xf32>, vector<16x32xf32> -> vector<16x32xf32>
    %14 = arith.addf %5, %13 : vector<16x32xf32>
    %c0_10 = arith.constant 0 : index
    %c0_11 = arith.constant 0 : index
    %15 = vector.load %arg3[%c0_10, %c0_11] : memref<16x16xf32, #tpu.memory_space<vmem>>, vector<16x16xf32>
    %c0_12 = arith.constant 0 : index
    %c0_13 = arith.constant 0 : index
    %c0_14 = arith.constant 0 : index
    %16 = vector.load %arg7[%c0_12, %c0_13, %c0_14] : memref<2x32x96xf32, #tpu.memory_space<vmem>>, vector<1x32x96xf32>
    %17 = vector.shape_cast %16 : vector<1x32x96xf32> to vector<32x96xf32>
    %cst_15 = arith.constant dense<0.000000e+00> : vector<16x96xf32>
    %18 = tpu.matmul %14, %17, %cst_15 {dimension_numbers = #tpu.dot_dimension_numbers<[1], [0], [0], [1], [0, 0, 1, 1], [], []>} : vector<16x32xf32>, vector<32x96xf32>, vector<16x96xf32> -> vector<16x96xf32>
    %c0_16 = arith.constant 0 : index
    %c0_17 = arith.constant 0 : index
    %c0_18 = arith.constant 0 : index
    %19 = vector.load %arg8[%c0_16, %c0_17, %c0_18] : memref<2x1x96xf32, #tpu.memory_space<vmem>>, vector<1x1x96xf32>
    %20 = vector.shape_cast %19 : vector<1x1x96xf32> to vector<1x96xf32>
    %21 = vector.broadcast %20 : vector<1x96xf32> to vector<16x96xf32>
    %22 = arith.addf %18, %21 : vector<16x96xf32>
    %c0_19 = arith.constant 0 : index
    %c0_20 = arith.constant 0 : index
    %c0_21 = arith.constant 0 : index
    %23 = vector.load %arg9[%c0_19, %c0_20, %c0_21] : memref<2x32x32xf32, #tpu.memory_space<vmem>>, vector<1x32x32xf32>
    %24 = vector.shape_cast %23 : vector<1x32x32xf32> to vector<32x32xf32>
    %cst_22 = arith.constant 0.000000e+00 : f32
    %25 = vector.broadcast %cst_22 : f32 to vector<16x32xf32>
    %26 = vector.extract_strided_slice %22 {offsets = [0, 0], sizes = [16, 8], strides = [1, 1]} : vector<16x96xf32> to vector<16x8xf32>
    %27 = vector.extract_strided_slice %22 {offsets = [0, 32], sizes = [16, 8], strides = [1, 1]} : vector<16x96xf32> to vector<16x8xf32>
    %28 = vector.extract_strided_slice %22 {offsets = [0, 64], sizes = [16, 8], strides = [1, 1]} : vector<16x96xf32> to vector<16x8xf32>
    %cst_23 = arith.constant dense<0.000000e+00> : vector<16x16xf32>
    %29 = tpu.matmul %26, %27, %cst_23 {dimension_numbers = #tpu.dot_dimension_numbers<[1], [1], [0], [0], [0, 0, 1, 0], [], []>} : vector<16x8xf32>, vector<16x8xf32>, vector<16x16xf32> -> vector<16x16xf32>
    %30 = arith.addf %29, %15 : vector<16x16xf32>
    %cst_24 = arith.constant dense<0xFF800000> : vector<16xf32>
    %31 = vector.multi_reduction <maximumf>, %30, %cst_24 [1] : vector<16x16xf32> to vector<16xf32>
    %32 = vector.shape_cast %31 : vector<16xf32> to vector<16x1xf32>
    %33 = vector.broadcast %32 : vector<16x1xf32> to vector<16x16xf32>
    %34 = arith.subf %30, %33 : vector<16x16xf32>
    %35 = math.exp %34 : vector<16x16xf32>
    %cst_25 = arith.constant dense<0.000000e+00> : vector<16xf32>
    %36 = vector.multi_reduction <add>, %35, %cst_25 [1] : vector<16x16xf32> to vector<16xf32>
    %37 = vector.shape_cast %36 : vector<16xf32> to vector<16x1xf32>
    %38 = tpu.reciprocal %37 {approx = true} : vector<16x1xf32> -> vector<16x1xf32>
    %39 = vector.broadcast %38 : vector<16x1xf32> to vector<16x16xf32>
    %40 = arith.mulf %35, %39 : vector<16x16xf32>
    %cst_26 = arith.constant dense<0.000000e+00> : vector<16x8xf32>
    %41 = tpu.matmul %40, %28, %cst_26 {dimension_numbers = #tpu.dot_dimension_numbers<[1], [0], [0], [1], [0, 0, 1, 1], [], []>} : vector<16x16xf32>, vector<16x8xf32>, vector<16x8xf32> -> vector<16x8xf32>
    %42 = vector.extract_strided_slice %24 {offsets = [0, 0], sizes = [8, 32], strides = [1, 1]} : vector<32x32xf32> to vector<8x32xf32>
    %cst_27 = arith.constant dense<0.000000e+00> : vector<16x32xf32>
    %43 = tpu.matmul %41, %42, %cst_27 {dimension_numbers = #tpu.dot_dimension_numbers<[1], [0], [0], [1], [0, 0, 1, 1], [], []>} : vector<16x8xf32>, vector<8x32xf32>, vector<16x32xf32> -> vector<16x32xf32>
    %44 = arith.addf %25, %43 : vector<16x32xf32>
    %45 = vector.extract_strided_slice %22 {offsets = [0, 8], sizes = [16, 8], strides = [1, 1]} : vector<16x96xf32> to vector<16x8xf32>
    %46 = vector.extract_strided_slice %22 {offsets = [0, 40], sizes = [16, 8], strides = [1, 1]} : vector<16x96xf32> to vector<16x8xf32>
    %47 = vector.extract_strided_slice %22 {offsets = [0, 72], sizes = [16, 8], strides = [1, 1]} : vector<16x96xf32> to vector<16x8xf32>
    %cst_28 = arith.constant dense<0.000000e+00> : vector<16x16xf32>
    %48 = tpu.matmul %45, %46, %cst_28 {dimension_numbers = #tpu.dot_dimension_numbers<[1], [1], [0], [0], [0, 0, 1, 0], [], []>} : vector<16x8xf32>, vector<16x8xf32>, vector<16x16xf32> -> vector<16x16xf32>
    %49 = arith.addf %48, %15 : vector<16x16xf32>
    %cst_29 = arith.constant dense<0xFF800000> : vector<16xf32>
    %50 = vector.multi_reduction <maximumf>, %49, %cst_29 [1] : vector<16x16xf32> to vector<16xf32>
    %51 = vector.shape_cast %50 : vector<16xf32> to vector<16x1xf32>
    %52 = vector.broadcast %51 : vector<16x1xf32> to vector<16x16xf32>
    %53 = arith.subf %49, %52 : vector<16x16xf32>
    %54 = math.exp %53 : vector<16x16xf32>
    %cst_30 = arith.constant dense<0.000000e+00> : vector<16xf32>
    %55 = vector.multi_reduction <add>, %54, %cst_30 [1] : vector<16x16xf32> to vector<16xf32>
    %56 = vector.shape_cast %55 : vector<16xf32> to vector<16x1xf32>
    %57 = tpu.reciprocal %56 {approx = true} : vector<16x1xf32> -> vector<16x1xf32>
    %58 = vector.broadcast %57 : vector<16x1xf32> to vector<16x16xf32>
    %59 = arith.mulf %54, %58 : vector<16x16xf32>
    %cst_31 = arith.constant dense<0.000000e+00> : vector<16x8xf32>
    %60 = tpu.matmul %59, %47, %cst_31 {dimension_numbers = #tpu.dot_dimension_numbers<[1], [0], [0], [1], [0, 0, 1, 1], [], []>} : vector<16x16xf32>, vector<16x8xf32>, vector<16x8xf32> -> vector<16x8xf32>
    %61 = vector.extract_strided_slice %24 {offsets = [8, 0], sizes = [8, 32], strides = [1, 1]} : vector<32x32xf32> to vector<8x32xf32>
    %cst_32 = arith.constant dense<0.000000e+00> : vector<16x32xf32>
    %62 = tpu.matmul %60, %61, %cst_32 {dimension_numbers = #tpu.dot_dimension_numbers<[1], [0], [0], [1], [0, 0, 1, 1], [], []>} : vector<16x8xf32>, vector<8x32xf32>, vector<16x32xf32> -> vector<16x32xf32>
    %63 = arith.addf %44, %62 : vector<16x32xf32>
    %64 = vector.extract_strided_slice %22 {offsets = [0, 16], sizes = [16, 8], strides = [1, 1]} : vector<16x96xf32> to vector<16x8xf32>
    %65 = vector.extract_strided_slice %22 {offsets = [0, 48], sizes = [16, 8], strides = [1, 1]} : vector<16x96xf32> to vector<16x8xf32>
    %66 = vector.extract_strided_slice %22 {offsets = [0, 80], sizes = [16, 8], strides = [1, 1]} : vector<16x96xf32> to vector<16x8xf32>
    %cst_33 = arith.constant dense<0.000000e+00> : vector<16x16xf32>
    %67 = tpu.matmul %64, %65, %cst_33 {dimension_numbers = #tpu.dot_dimension_numbers<[1], [1], [0], [0], [0, 0, 1, 0], [], []>} : vector<16x8xf32>, vector<16x8xf32>, vector<16x16xf32> -> vector<16x16xf32>
    %68 = arith.addf %67, %15 : vector<16x16xf32>
    %cst_34 = arith.constant dense<0xFF800000> : vector<16xf32>
    %69 = vector.multi_reduction <maximumf>, %68, %cst_34 [1] : vector<16x16xf32> to vector<16xf32>
    %70 = vector.shape_cast %69 : vector<16xf32> to vector<16x1xf32>
    %71 = vector.broadcast %70 : vector<16x1xf32> to vector<16x16xf32>
    %72 = arith.subf %68, %71 : vector<16x16xf32>
    %73 = math.exp %72 : vector<16x16xf32>
    %cst_35 = arith.constant dense<0.000000e+00> : vector<16xf32>
    %74 = vector.multi_reduction <add>, %73, %cst_35 [1] : vector<16x16xf32> to vector<16xf32>
    %75 = vector.shape_cast %74 : vector<16xf32> to vector<16x1xf32>
    %76 = tpu.reciprocal %75 {approx = true} : vector<16x1xf32> -> vector<16x1xf32>
    %77 = vector.broadcast %76 : vector<16x1xf32> to vector<16x16xf32>
    %78 = arith.mulf %73, %77 : vector<16x16xf32>
    %cst_36 = arith.constant dense<0.000000e+00> : vector<16x8xf32>
    %79 = tpu.matmul %78, %66, %cst_36 {dimension_numbers = #tpu.dot_dimension_numbers<[1], [0], [0], [1], [0, 0, 1, 1], [], []>} : vector<16x16xf32>, vector<16x8xf32>, vector<16x8xf32> -> vector<16x8xf32>
    %80 = vector.extract_strided_slice %24 {offsets = [16, 0], sizes = [8, 32], strides = [1, 1]} : vector<32x32xf32> to vector<8x32xf32>
    %cst_37 = arith.constant dense<0.000000e+00> : vector<16x32xf32>
    %81 = tpu.matmul %79, %80, %cst_37 {dimension_numbers = #tpu.dot_dimension_numbers<[1], [0], [0], [1], [0, 0, 1, 1], [], []>} : vector<16x8xf32>, vector<8x32xf32>, vector<16x32xf32> -> vector<16x32xf32>
    %82 = arith.addf %63, %81 : vector<16x32xf32>
    %83 = vector.extract_strided_slice %22 {offsets = [0, 24], sizes = [16, 8], strides = [1, 1]} : vector<16x96xf32> to vector<16x8xf32>
    %84 = vector.extract_strided_slice %22 {offsets = [0, 56], sizes = [16, 8], strides = [1, 1]} : vector<16x96xf32> to vector<16x8xf32>
    %85 = vector.extract_strided_slice %22 {offsets = [0, 88], sizes = [16, 8], strides = [1, 1]} : vector<16x96xf32> to vector<16x8xf32>
    %cst_38 = arith.constant dense<0.000000e+00> : vector<16x16xf32>
    %86 = tpu.matmul %83, %84, %cst_38 {dimension_numbers = #tpu.dot_dimension_numbers<[1], [1], [0], [0], [0, 0, 1, 0], [], []>} : vector<16x8xf32>, vector<16x8xf32>, vector<16x16xf32> -> vector<16x16xf32>
    %87 = arith.addf %86, %15 : vector<16x16xf32>
    %cst_39 = arith.constant dense<0xFF800000> : vector<16xf32>
    %88 = vector.multi_reduction <maximumf>, %87, %cst_39 [1] : vector<16x16xf32> to vector<16xf32>
    %89 = vector.shape_cast %88 : vector<16xf32> to vector<16x1xf32>
    %90 = vector.broadcast %89 : vector<16x1xf32> to vector<16x16xf32>
    %91 = arith.subf %87, %90 : vector<16x16xf32>
    %92 = math.exp %91 : vector<16x16xf32>
    %cst_40 = arith.constant dense<0.000000e+00> : vector<16xf32>
    %93 = vector.multi_reduction <add>, %92, %cst_40 [1] : vector<16x16xf32> to vector<16xf32>
    %94 = vector.shape_cast %93 : vector<16xf32> to vector<16x1xf32>
    %95 = tpu.reciprocal %94 {approx = true} : vector<16x1xf32> -> vector<16x1xf32>
    %96 = vector.broadcast %95 : vector<16x1xf32> to vector<16x16xf32>
    %97 = arith.mulf %92, %96 : vector<16x16xf32>
    %cst_41 = arith.constant dense<0.000000e+00> : vector<16x8xf32>
    %98 = tpu.matmul %97, %85, %cst_41 {dimension_numbers = #tpu.dot_dimension_numbers<[1], [0], [0], [1], [0, 0, 1, 1], [], []>} : vector<16x16xf32>, vector<16x8xf32>, vector<16x8xf32> -> vector<16x8xf32>
    %99 = vector.extract_strided_slice %24 {offsets = [24, 0], sizes = [8, 32], strides = [1, 1]} : vector<32x32xf32> to vector<8x32xf32>
    %cst_42 = arith.constant dense<0.000000e+00> : vector<16x32xf32>
    %100 = tpu.matmul %98, %99, %cst_42 {dimension_numbers = #tpu.dot_dimension_numbers<[1], [0], [0], [1], [0, 0, 1, 1], [], []>} : vector<16x8xf32>, vector<8x32xf32>, vector<16x32xf32> -> vector<16x32xf32>
    %101 = arith.addf %82, %100 : vector<16x32xf32>
    %c0_43 = arith.constant 0 : index
    %c0_44 = arith.constant 0 : index
    %c0_45 = arith.constant 0 : index
    %102 = vector.load %arg10[%c0_43, %c0_44, %c0_45] : memref<2x1x32xf32, #tpu.memory_space<vmem>>, vector<1x1x32xf32>
    %103 = vector.shape_cast %102 : vector<1x1x32xf32> to vector<1x32xf32>
    %104 = vector.broadcast %103 : vector<1x32xf32> to vector<16x32xf32>
    %105 = arith.addf %101, %104 : vector<16x32xf32>
    %106 = arith.addf %14, %105 : vector<16x32xf32>
    %c0_46 = arith.constant 0 : index
    %c0_47 = arith.constant 0 : index
    %c0_48 = arith.constant 0 : index
    %107 = vector.load %arg11[%c0_46, %c0_47, %c0_48] : memref<2x1x32xf32, #tpu.memory_space<vmem>>, vector<1x1x32xf32>
    %108 = vector.shape_cast %107 : vector<1x1x32xf32> to vector<1x32xf32>
    %c0_49 = arith.constant 0 : index
    %c0_50 = arith.constant 0 : index
    %c0_51 = arith.constant 0 : index
    %109 = vector.load %arg12[%c0_49, %c0_50, %c0_51] : memref<2x1x32xf32, #tpu.memory_space<vmem>>, vector<1x1x32xf32>
    %110 = vector.shape_cast %109 : vector<1x1x32xf32> to vector<1x32xf32>
    %cst_52 = arith.constant dense<0.000000e+00> : vector<16xf32>
    %111 = vector.multi_reduction <add>, %106, %cst_52 [1] : vector<16x32xf32> to vector<16xf32>
    %112 = vector.shape_cast %111 : vector<16xf32> to vector<16x1xf32>
    %cst_53 = arith.constant 3.200000e+01 : f32
    %113 = vector.broadcast %cst_53 : f32 to vector<16x1xf32>
    %114 = arith.divf %112, %113 : vector<16x1xf32>
    %115 = vector.broadcast %114 : vector<16x1xf32> to vector<16x32xf32>
    %116 = arith.subf %106, %115 : vector<16x32xf32>
    %117 = arith.mulf %116, %116 : vector<16x32xf32>
    %cst_54 = arith.constant dense<0.000000e+00> : vector<16xf32>
    %118 = vector.multi_reduction <add>, %117, %cst_54 [1] : vector<16x32xf32> to vector<16xf32>
    %119 = vector.shape_cast %118 : vector<16xf32> to vector<16x1xf32>
    %cst_55 = arith.constant 3.200000e+01 : f32
    %120 = vector.broadcast %cst_55 : f32 to vector<16x1xf32>
    %121 = arith.divf %119, %120 : vector<16x1xf32>
    %cst_56 = arith.constant 9.99999974E-6 : f32
    %122 = vector.broadcast %cst_56 : f32 to vector<16x1xf32>
    %123 = arith.addf %121, %122 : vector<16x1xf32>
    %124 = math.rsqrt %123 : vector<16x1xf32>
    %125 = vector.broadcast %124 : vector<16x1xf32> to vector<16x32xf32>
    %126 = arith.mulf %116, %125 : vector<16x32xf32>
    %127 = vector.broadcast %108 : vector<1x32xf32> to vector<16x32xf32>
    %128 = arith.mulf %126, %127 : vector<16x32xf32>
    %129 = vector.broadcast %110 : vector<1x32xf32> to vector<16x32xf32>
    %130 = arith.addf %128, %129 : vector<16x32xf32>
    %c0_57 = arith.constant 0 : index
    %c0_58 = arith.constant 0 : index
    %c0_59 = arith.constant 0 : index
    %131 = vector.load %arg13[%c0_57, %c0_58, %c0_59] : memref<2x32x128xf32, #tpu.memory_space<vmem>>, vector<1x32x128xf32>
    %132 = vector.shape_cast %131 : vector<1x32x128xf32> to vector<32x128xf32>
    %cst_60 = arith.constant dense<0.000000e+00> : vector<16x128xf32>
    %133 = tpu.matmul %130, %132, %cst_60 {dimension_numbers = #tpu.dot_dimension_numbers<[1], [0], [0], [1], [0, 0, 1, 1], [], []>} : vector<16x32xf32>, vector<32x128xf32>, vector<16x128xf32> -> vector<16x128xf32>
    %c0_61 = arith.constant 0 : index
    %c0_62 = arith.constant 0 : index
    %c0_63 = arith.constant 0 : index
    %134 = vector.load %arg14[%c0_61, %c0_62, %c0_63] : memref<2x1x128xf32, #tpu.memory_space<vmem>>, vector<1x1x128xf32>
    %135 = vector.shape_cast %134 : vector<1x1x128xf32> to vector<1x128xf32>
    %136 = vector.broadcast %135 : vector<1x128xf32> to vector<16x128xf32>
    %137 = arith.addf %133, %136 : vector<16x128xf32>
    %cst_64 = arith.constant 0.000000e+00 : f32
    %138 = vector.broadcast %cst_64 : f32 to vector<16x128xf32>
    %139 = arith.maximumf %137, %138 : vector<16x128xf32>
    %c0_65 = arith.constant 0 : index
    %c0_66 = arith.constant 0 : index
    %c0_67 = arith.constant 0 : index
    %140 = vector.load %arg15[%c0_65, %c0_66, %c0_67] : memref<2x128x32xf32, #tpu.memory_space<vmem>>, vector<1x128x32xf32>
    %141 = vector.shape_cast %140 : vector<1x128x32xf32> to vector<128x32xf32>
    %cst_68 = arith.constant dense<0.000000e+00> : vector<16x32xf32>
    %142 = tpu.matmul %139, %141, %cst_68 {dimension_numbers = #tpu.dot_dimension_numbers<[1], [0], [0], [1], [0, 0, 1, 1], [], []>} : vector<16x128xf32>, vector<128x32xf32>, vector<16x32xf32> -> vector<16x32xf32>
    %143 = arith.addf %130, %142 : vector<16x32xf32>
    %c0_69 = arith.constant 0 : index
    %c0_70 = arith.constant 0 : index
    %c0_71 = arith.constant 0 : index
    %144 = vector.load %arg16[%c0_69, %c0_70, %c0_71] : memref<2x1x32xf32, #tpu.memory_space<vmem>>, vector<1x1x32xf32>
    %145 = vector.shape_cast %144 : vector<1x1x32xf32> to vector<1x32xf32>
    %146 = vector.broadcast %145 : vector<1x32xf32> to vector<16x32xf32>
    %147 = arith.addf %143, %146 : vector<16x32xf32>
    %c0_72 = arith.constant 0 : index
    %c0_73 = arith.constant 0 : index
    %c0_74 = arith.constant 0 : index
    %148 = vector.load %arg17[%c0_72, %c0_73, %c0_74] : memref<2x1x32xf32, #tpu.memory_space<vmem>>, vector<1x1x32xf32>
    %149 = vector.shape_cast %148 : vector<1x1x32xf32> to vector<1x32xf32>
    %c0_75 = arith.constant 0 : index
    %c0_76 = arith.constant 0 : index
    %c0_77 = arith.constant 0 : index
    %150 = vector.load %arg18[%c0_75, %c0_76, %c0_77] : memref<2x1x32xf32, #tpu.memory_space<vmem>>, vector<1x1x32xf32>
    %151 = vector.shape_cast %150 : vector<1x1x32xf32> to vector<1x32xf32>
    %cst_78 = arith.constant dense<0.000000e+00> : vector<16xf32>
    %152 = vector.multi_reduction <add>, %147, %cst_78 [1] : vector<16x32xf32> to vector<16xf32>
    %153 = vector.shape_cast %152 : vector<16xf32> to vector<16x1xf32>
    %cst_79 = arith.constant 3.200000e+01 : f32
    %154 = vector.broadcast %cst_79 : f32 to vector<16x1xf32>
    %155 = arith.divf %153, %154 : vector<16x1xf32>
    %156 = vector.broadcast %155 : vector<16x1xf32> to vector<16x32xf32>
    %157 = arith.subf %147, %156 : vector<16x32xf32>
    %158 = arith.mulf %157, %157 : vector<16x32xf32>
    %cst_80 = arith.constant dense<0.000000e+00> : vector<16xf32>
    %159 = vector.multi_reduction <add>, %158, %cst_80 [1] : vector<16x32xf32> to vector<16xf32>
    %160 = vector.shape_cast %159 : vector<16xf32> to vector<16x1xf32>
    %cst_81 = arith.constant 3.200000e+01 : f32
    %161 = vector.broadcast %cst_81 : f32 to vector<16x1xf32>
    %162 = arith.divf %160, %161 : vector<16x1xf32>
    %cst_82 = arith.constant 9.99999974E-6 : f32
    %163 = vector.broadcast %cst_82 : f32 to vector<16x1xf32>
    %164 = arith.addf %162, %163 : vector<16x1xf32>
    %165 = math.rsqrt %164 : vector<16x1xf32>
    %166 = vector.broadcast %165 : vector<16x1xf32> to vector<16x32xf32>
    %167 = arith.mulf %157, %166 : vector<16x32xf32>
    %168 = vector.broadcast %149 : vector<1x32xf32> to vector<16x32xf32>
    %169 = arith.mulf %167, %168 : vector<16x32xf32>
    %170 = vector.broadcast %151 : vector<1x32xf32> to vector<16x32xf32>
    %171 = arith.addf %169, %170 : vector<16x32xf32>
    %c1 = arith.constant 1 : index
    %c0_83 = arith.constant 0 : index
    %c0_84 = arith.constant 0 : index
    %172 = vector.load %arg7[%c1, %c0_83, %c0_84] : memref<2x32x96xf32, #tpu.memory_space<vmem>>, vector<1x32x96xf32>
    %173 = vector.shape_cast %172 : vector<1x32x96xf32> to vector<32x96xf32>
    %cst_85 = arith.constant dense<0.000000e+00> : vector<16x96xf32>
    %174 = tpu.matmul %171, %173, %cst_85 {dimension_numbers = #tpu.dot_dimension_numbers<[1], [0], [0], [1], [0, 0, 1, 1], [], []>} : vector<16x32xf32>, vector<32x96xf32>, vector<16x96xf32> -> vector<16x96xf32>
    %c1_86 = arith.constant 1 : index
    %c0_87 = arith.constant 0 : index
    %c0_88 = arith.constant 0 : index
    %175 = vector.load %arg8[%c1_86, %c0_87, %c0_88] : memref<2x1x96xf32, #tpu.memory_space<vmem>>, vector<1x1x96xf32>
    %176 = vector.shape_cast %175 : vector<1x1x96xf32> to vector<1x96xf32>
    %177 = vector.broadcast %176 : vector<1x96xf32> to vector<16x96xf32>
    %178 = arith.addf %174, %177 : vector<16x96xf32>
    %c1_89 = arith.constant 1 : index
    %c0_90 = arith.constant 0 : index
    %c0_91 = arith.constant 0 : index
    %179 = vector.load %arg9[%c1_89, %c0_90, %c0_91] : memref<2x32x32xf32, #tpu.memory_space<vmem>>, vector<1x32x32xf32>
    %180 = vector.shape_cast %179 : vector<1x32x32xf32> to vector<32x32xf32>
    %cst_92 = arith.constant 0.000000e+00 : f32
    %181 = vector.broadcast %cst_92 : f32 to vector<16x32xf32>
    %182 = vector.extract_strided_slice %178 {offsets = [0, 0], sizes = [16, 8], strides = [1, 1]} : vector<16x96xf32> to vector<16x8xf32>
    %183 = vector.extract_strided_slice %178 {offsets = [0, 32], sizes = [16, 8], strides = [1, 1]} : vector<16x96xf32> to vector<16x8xf32>
    %184 = vector.extract_strided_slice %178 {offsets = [0, 64], sizes = [16, 8], strides = [1, 1]} : vector<16x96xf32> to vector<16x8xf32>
    %cst_93 = arith.constant dense<0.000000e+00> : vector<16x16xf32>
    %185 = tpu.matmul %182, %183, %cst_93 {dimension_numbers = #tpu.dot_dimension_numbers<[1], [1], [0], [0], [0, 0, 1, 0], [], []>} : vector<16x8xf32>, vector<16x8xf32>, vector<16x16xf32> -> vector<16x16xf32>
    %186 = arith.addf %185, %15 : vector<16x16xf32>
    %cst_94 = arith.constant dense<0xFF800000> : vector<16xf32>
    %187 = vector.multi_reduction <maximumf>, %186, %cst_94 [1] : vector<16x16xf32> to vector<16xf32>
    %188 = vector.shape_cast %187 : vector<16xf32> to vector<16x1xf32>
    %189 = vector.broadcast %188 : vector<16x1xf32> to vector<16x16xf32>
    %190 = arith.subf %186, %189 : vector<16x16xf32>
    %191 = math.exp %190 : vector<16x16xf32>
    %cst_95 = arith.constant dense<0.000000e+00> : vector<16xf32>
    %192 = vector.multi_reduction <add>, %191, %cst_95 [1] : vector<16x16xf32> to vector<16xf32>
    %193 = vector.shape_cast %192 : vector<16xf32> to vector<16x1xf32>
    %194 = tpu.reciprocal %193 {approx = true} : vector<16x1xf32> -> vector<16x1xf32>
    %195 = vector.broadcast %194 : vector<16x1xf32> to vector<16x16xf32>
    %196 = arith.mulf %191, %195 : vector<16x16xf32>
    %cst_96 = arith.constant dense<0.000000e+00> : vector<16x8xf32>
    %197 = tpu.matmul %196, %184, %cst_96 {dimension_numbers = #tpu.dot_dimension_numbers<[1], [0], [0], [1], [0, 0, 1, 1], [], []>} : vector<16x16xf32>, vector<16x8xf32>, vector<16x8xf32> -> vector<16x8xf32>
    %198 = vector.extract_strided_slice %180 {offsets = [0, 0], sizes = [8, 32], strides = [1, 1]} : vector<32x32xf32> to vector<8x32xf32>
    %cst_97 = arith.constant dense<0.000000e+00> : vector<16x32xf32>
    %199 = tpu.matmul %197, %198, %cst_97 {dimension_numbers = #tpu.dot_dimension_numbers<[1], [0], [0], [1], [0, 0, 1, 1], [], []>} : vector<16x8xf32>, vector<8x32xf32>, vector<16x32xf32> -> vector<16x32xf32>
    %200 = arith.addf %181, %199 : vector<16x32xf32>
    %201 = vector.extract_strided_slice %178 {offsets = [0, 8], sizes = [16, 8], strides = [1, 1]} : vector<16x96xf32> to vector<16x8xf32>
    %202 = vector.extract_strided_slice %178 {offsets = [0, 40], sizes = [16, 8], strides = [1, 1]} : vector<16x96xf32> to vector<16x8xf32>
    %203 = vector.extract_strided_slice %178 {offsets = [0, 72], sizes = [16, 8], strides = [1, 1]} : vector<16x96xf32> to vector<16x8xf32>
    %cst_98 = arith.constant dense<0.000000e+00> : vector<16x16xf32>
    %204 = tpu.matmul %201, %202, %cst_98 {dimension_numbers = #tpu.dot_dimension_numbers<[1], [1], [0], [0], [0, 0, 1, 0], [], []>} : vector<16x8xf32>, vector<16x8xf32>, vector<16x16xf32> -> vector<16x16xf32>
    %205 = arith.addf %204, %15 : vector<16x16xf32>
    %cst_99 = arith.constant dense<0xFF800000> : vector<16xf32>
    %206 = vector.multi_reduction <maximumf>, %205, %cst_99 [1] : vector<16x16xf32> to vector<16xf32>
    %207 = vector.shape_cast %206 : vector<16xf32> to vector<16x1xf32>
    %208 = vector.broadcast %207 : vector<16x1xf32> to vector<16x16xf32>
    %209 = arith.subf %205, %208 : vector<16x16xf32>
    %210 = math.exp %209 : vector<16x16xf32>
    %cst_100 = arith.constant dense<0.000000e+00> : vector<16xf32>
    %211 = vector.multi_reduction <add>, %210, %cst_100 [1] : vector<16x16xf32> to vector<16xf32>
    %212 = vector.shape_cast %211 : vector<16xf32> to vector<16x1xf32>
    %213 = tpu.reciprocal %212 {approx = true} : vector<16x1xf32> -> vector<16x1xf32>
    %214 = vector.broadcast %213 : vector<16x1xf32> to vector<16x16xf32>
    %215 = arith.mulf %210, %214 : vector<16x16xf32>
    %cst_101 = arith.constant dense<0.000000e+00> : vector<16x8xf32>
    %216 = tpu.matmul %215, %203, %cst_101 {dimension_numbers = #tpu.dot_dimension_numbers<[1], [0], [0], [1], [0, 0, 1, 1], [], []>} : vector<16x16xf32>, vector<16x8xf32>, vector<16x8xf32> -> vector<16x8xf32>
    %217 = vector.extract_strided_slice %180 {offsets = [8, 0], sizes = [8, 32], strides = [1, 1]} : vector<32x32xf32> to vector<8x32xf32>
    %cst_102 = arith.constant dense<0.000000e+00> : vector<16x32xf32>
    %218 = tpu.matmul %216, %217, %cst_102 {dimension_numbers = #tpu.dot_dimension_numbers<[1], [0], [0], [1], [0, 0, 1, 1], [], []>} : vector<16x8xf32>, vector<8x32xf32>, vector<16x32xf32> -> vector<16x32xf32>
    %219 = arith.addf %200, %218 : vector<16x32xf32>
    %220 = vector.extract_strided_slice %178 {offsets = [0, 16], sizes = [16, 8], strides = [1, 1]} : vector<16x96xf32> to vector<16x8xf32>
    %221 = vector.extract_strided_slice %178 {offsets = [0, 48], sizes = [16, 8], strides = [1, 1]} : vector<16x96xf32> to vector<16x8xf32>
    %222 = vector.extract_strided_slice %178 {offsets = [0, 80], sizes = [16, 8], strides = [1, 1]} : vector<16x96xf32> to vector<16x8xf32>
    %cst_103 = arith.constant dense<0.000000e+00> : vector<16x16xf32>
    %223 = tpu.matmul %220, %221, %cst_103 {dimension_numbers = #tpu.dot_dimension_numbers<[1], [1], [0], [0], [0, 0, 1, 0], [], []>} : vector<16x8xf32>, vector<16x8xf32>, vector<16x16xf32> -> vector<16x16xf32>
    %224 = arith.addf %223, %15 : vector<16x16xf32>
    %cst_104 = arith.constant dense<0xFF800000> : vector<16xf32>
    %225 = vector.multi_reduction <maximumf>, %224, %cst_104 [1] : vector<16x16xf32> to vector<16xf32>
    %226 = vector.shape_cast %225 : vector<16xf32> to vector<16x1xf32>
    %227 = vector.broadcast %226 : vector<16x1xf32> to vector<16x16xf32>
    %228 = arith.subf %224, %227 : vector<16x16xf32>
    %229 = math.exp %228 : vector<16x16xf32>
    %cst_105 = arith.constant dense<0.000000e+00> : vector<16xf32>
    %230 = vector.multi_reduction <add>, %229, %cst_105 [1] : vector<16x16xf32> to vector<16xf32>
    %231 = vector.shape_cast %230 : vector<16xf32> to vector<16x1xf32>
    %232 = tpu.reciprocal %231 {approx = true} : vector<16x1xf32> -> vector<16x1xf32>
    %233 = vector.broadcast %232 : vector<16x1xf32> to vector<16x16xf32>
    %234 = arith.mulf %229, %233 : vector<16x16xf32>
    %cst_106 = arith.constant dense<0.000000e+00> : vector<16x8xf32>
    %235 = tpu.matmul %234, %222, %cst_106 {dimension_numbers = #tpu.dot_dimension_numbers<[1], [0], [0], [1], [0, 0, 1, 1], [], []>} : vector<16x16xf32>, vector<16x8xf32>, vector<16x8xf32> -> vector<16x8xf32>
    %236 = vector.extract_strided_slice %180 {offsets = [16, 0], sizes = [8, 32], strides = [1, 1]} : vector<32x32xf32> to vector<8x32xf32>
    %cst_107 = arith.constant dense<0.000000e+00> : vector<16x32xf32>
    %237 = tpu.matmul %235, %236, %cst_107 {dimension_numbers = #tpu.dot_dimension_numbers<[1], [0], [0], [1], [0, 0, 1, 1], [], []>} : vector<16x8xf32>, vector<8x32xf32>, vector<16x32xf32> -> vector<16x32xf32>
    %238 = arith.addf %219, %237 : vector<16x32xf32>
    %239 = vector.extract_strided_slice %178 {offsets = [0, 24], sizes = [16, 8], strides = [1, 1]} : vector<16x96xf32> to vector<16x8xf32>
    %240 = vector.extract_strided_slice %178 {offsets = [0, 56], sizes = [16, 8], strides = [1, 1]} : vector<16x96xf32> to vector<16x8xf32>
    %241 = vector.extract_strided_slice %178 {offsets = [0, 88], sizes = [16, 8], strides = [1, 1]} : vector<16x96xf32> to vector<16x8xf32>
    %cst_108 = arith.constant dense<0.000000e+00> : vector<16x16xf32>
    %242 = tpu.matmul %239, %240, %cst_108 {dimension_numbers = #tpu.dot_dimension_numbers<[1], [1], [0], [0], [0, 0, 1, 0], [], []>} : vector<16x8xf32>, vector<16x8xf32>, vector<16x16xf32> -> vector<16x16xf32>
    %243 = arith.addf %242, %15 : vector<16x16xf32>
    %cst_109 = arith.constant dense<0xFF800000> : vector<16xf32>
    %244 = vector.multi_reduction <maximumf>, %243, %cst_109 [1] : vector<16x16xf32> to vector<16xf32>
    %245 = vector.shape_cast %244 : vector<16xf32> to vector<16x1xf32>
    %246 = vector.broadcast %245 : vector<16x1xf32> to vector<16x16xf32>
    %247 = arith.subf %243, %246 : vector<16x16xf32>
    %248 = math.exp %247 : vector<16x16xf32>
    %cst_110 = arith.constant dense<0.000000e+00> : vector<16xf32>
    %249 = vector.multi_reduction <add>, %248, %cst_110 [1] : vector<16x16xf32> to vector<16xf32>
    %250 = vector.shape_cast %249 : vector<16xf32> to vector<16x1xf32>
    %251 = tpu.reciprocal %250 {approx = true} : vector<16x1xf32> -> vector<16x1xf32>
    %252 = vector.broadcast %251 : vector<16x1xf32> to vector<16x16xf32>
    %253 = arith.mulf %248, %252 : vector<16x16xf32>
    %cst_111 = arith.constant dense<0.000000e+00> : vector<16x8xf32>
    %254 = tpu.matmul %253, %241, %cst_111 {dimension_numbers = #tpu.dot_dimension_numbers<[1], [0], [0], [1], [0, 0, 1, 1], [], []>} : vector<16x16xf32>, vector<16x8xf32>, vector<16x8xf32> -> vector<16x8xf32>
    %255 = vector.extract_strided_slice %180 {offsets = [24, 0], sizes = [8, 32], strides = [1, 1]} : vector<32x32xf32> to vector<8x32xf32>
    %cst_112 = arith.constant dense<0.000000e+00> : vector<16x32xf32>
    %256 = tpu.matmul %254, %255, %cst_112 {dimension_numbers = #tpu.dot_dimension_numbers<[1], [0], [0], [1], [0, 0, 1, 1], [], []>} : vector<16x8xf32>, vector<8x32xf32>, vector<16x32xf32> -> vector<16x32xf32>
    %257 = arith.addf %238, %256 : vector<16x32xf32>
    %c1_113 = arith.constant 1 : index
    %c0_114 = arith.constant 0 : index
    %c0_115 = arith.constant 0 : index
    %258 = vector.load %arg10[%c1_113, %c0_114, %c0_115] : memref<2x1x32xf32, #tpu.memory_space<vmem>>, vector<1x1x32xf32>
    %259 = vector.shape_cast %258 : vector<1x1x32xf32> to vector<1x32xf32>
    %260 = vector.broadcast %259 : vector<1x32xf32> to vector<16x32xf32>
    %261 = arith.addf %257, %260 : vector<16x32xf32>
    %262 = arith.addf %171, %261 : vector<16x32xf32>
    %c1_116 = arith.constant 1 : index
    %c0_117 = arith.constant 0 : index
    %c0_118 = arith.constant 0 : index
    %263 = vector.load %arg11[%c1_116, %c0_117, %c0_118] : memref<2x1x32xf32, #tpu.memory_space<vmem>>, vector<1x1x32xf32>
    %264 = vector.shape_cast %263 : vector<1x1x32xf32> to vector<1x32xf32>
    %c1_119 = arith.constant 1 : index
    %c0_120 = arith.constant 0 : index
    %c0_121 = arith.constant 0 : index
    %265 = vector.load %arg12[%c1_119, %c0_120, %c0_121] : memref<2x1x32xf32, #tpu.memory_space<vmem>>, vector<1x1x32xf32>
    %266 = vector.shape_cast %265 : vector<1x1x32xf32> to vector<1x32xf32>
    %cst_122 = arith.constant dense<0.000000e+00> : vector<16xf32>
    %267 = vector.multi_reduction <add>, %262, %cst_122 [1] : vector<16x32xf32> to vector<16xf32>
    %268 = vector.shape_cast %267 : vector<16xf32> to vector<16x1xf32>
    %cst_123 = arith.constant 3.200000e+01 : f32
    %269 = vector.broadcast %cst_123 : f32 to vector<16x1xf32>
    %270 = arith.divf %268, %269 : vector<16x1xf32>
    %271 = vector.broadcast %270 : vector<16x1xf32> to vector<16x32xf32>
    %272 = arith.subf %262, %271 : vector<16x32xf32>
    %273 = arith.mulf %272, %272 : vector<16x32xf32>
    %cst_124 = arith.constant dense<0.000000e+00> : vector<16xf32>
    %274 = vector.multi_reduction <add>, %273, %cst_124 [1] : vector<16x32xf32> to vector<16xf32>
    %275 = vector.shape_cast %274 : vector<16xf32> to vector<16x1xf32>
    %cst_125 = arith.constant 3.200000e+01 : f32
    %276 = vector.broadcast %cst_125 : f32 to vector<16x1xf32>
    %277 = arith.divf %275, %276 : vector<16x1xf32>
    %cst_126 = arith.constant 9.99999974E-6 : f32
    %278 = vector.broadcast %cst_126 : f32 to vector<16x1xf32>
    %279 = arith.addf %277, %278 : vector<16x1xf32>
    %280 = math.rsqrt %279 : vector<16x1xf32>
    %281 = vector.broadcast %280 : vector<16x1xf32> to vector<16x32xf32>
    %282 = arith.mulf %272, %281 : vector<16x32xf32>
    %283 = vector.broadcast %264 : vector<1x32xf32> to vector<16x32xf32>
    %284 = arith.mulf %282, %283 : vector<16x32xf32>
    %285 = vector.broadcast %266 : vector<1x32xf32> to vector<16x32xf32>
    %286 = arith.addf %284, %285 : vector<16x32xf32>
    %c1_127 = arith.constant 1 : index
    %c0_128 = arith.constant 0 : index
    %c0_129 = arith.constant 0 : index
    %287 = vector.load %arg13[%c1_127, %c0_128, %c0_129] : memref<2x32x128xf32, #tpu.memory_space<vmem>>, vector<1x32x128xf32>
    %288 = vector.shape_cast %287 : vector<1x32x128xf32> to vector<32x128xf32>
    %cst_130 = arith.constant dense<0.000000e+00> : vector<16x128xf32>
    %289 = tpu.matmul %286, %288, %cst_130 {dimension_numbers = #tpu.dot_dimension_numbers<[1], [0], [0], [1], [0, 0, 1, 1], [], []>} : vector<16x32xf32>, vector<32x128xf32>, vector<16x128xf32> -> vector<16x128xf32>
    %c1_131 = arith.constant 1 : index
    %c0_132 = arith.constant 0 : index
    %c0_133 = arith.constant 0 : index
    %290 = vector.load %arg14[%c1_131, %c0_132, %c0_133] : memref<2x1x128xf32, #tpu.memory_space<vmem>>, vector<1x1x128xf32>
    %291 = vector.shape_cast %290 : vector<1x1x128xf32> to vector<1x128xf32>
    %292 = vector.broadcast %291 : vector<1x128xf32> to vector<16x128xf32>
    %293 = arith.addf %289, %292 : vector<16x128xf32>
    %cst_134 = arith.constant 0.000000e+00 : f32
    %294 = vector.broadcast %cst_134 : f32 to vector<16x128xf32>
    %295 = arith.maximumf %293, %294 : vector<16x128xf32>
    %c1_135 = arith.constant 1 : index
    %c0_136 = arith.constant 0 : index
    %c0_137 = arith.constant 0 : index
    %296 = vector.load %arg15[%c1_135, %c0_136, %c0_137] : memref<2x128x32xf32, #tpu.memory_space<vmem>>, vector<1x128x32xf32>
    %297 = vector.shape_cast %296 : vector<1x128x32xf32> to vector<128x32xf32>
    %cst_138 = arith.constant dense<0.000000e+00> : vector<16x32xf32>
    %298 = tpu.matmul %295, %297, %cst_138 {dimension_numbers = #tpu.dot_dimension_numbers<[1], [0], [0], [1], [0, 0, 1, 1], [], []>} : vector<16x128xf32>, vector<128x32xf32>, vector<16x32xf32> -> vector<16x32xf32>
    %299 = arith.addf %286, %298 : vector<16x32xf32>
    %c1_139 = arith.constant 1 : index
    %c0_140 = arith.constant 0 : index
    %c0_141 = arith.constant 0 : index
    %300 = vector.load %arg16[%c1_139, %c0_140, %c0_141] : memref<2x1x32xf32, #tpu.memory_space<vmem>>, vector<1x1x32xf32>
    %301 = vector.shape_cast %300 : vector<1x1x32xf32> to vector<1x32xf32>
    %302 = vector.broadcast %301 : vector<1x32xf32> to vector<16x32xf32>
    %303 = arith.addf %299, %302 : vector<16x32xf32>
    %c1_142 = arith.constant 1 : index
    %c0_143 = arith.constant 0 : index
    %c0_144 = arith.constant 0 : index
    %304 = vector.load %arg17[%c1_142, %c0_143, %c0_144] : memref<2x1x32xf32, #tpu.memory_space<vmem>>, vector<1x1x32xf32>
    %305 = vector.shape_cast %304 : vector<1x1x32xf32> to vector<1x32xf32>
    %c1_145 = arith.constant 1 : index
    %c0_146 = arith.constant 0 : index
    %c0_147 = arith.constant 0 : index
    %306 = vector.load %arg18[%c1_145, %c0_146, %c0_147] : memref<2x1x32xf32, #tpu.memory_space<vmem>>, vector<1x1x32xf32>
    %307 = vector.shape_cast %306 : vector<1x1x32xf32> to vector<1x32xf32>
    %cst_148 = arith.constant dense<0.000000e+00> : vector<16xf32>
    %308 = vector.multi_reduction <add>, %303, %cst_148 [1] : vector<16x32xf32> to vector<16xf32>
    %309 = vector.shape_cast %308 : vector<16xf32> to vector<16x1xf32>
    %cst_149 = arith.constant 3.200000e+01 : f32
    %310 = vector.broadcast %cst_149 : f32 to vector<16x1xf32>
    %311 = arith.divf %309, %310 : vector<16x1xf32>
    %312 = vector.broadcast %311 : vector<16x1xf32> to vector<16x32xf32>
    %313 = arith.subf %303, %312 : vector<16x32xf32>
    %314 = arith.mulf %313, %313 : vector<16x32xf32>
    %cst_150 = arith.constant dense<0.000000e+00> : vector<16xf32>
    %315 = vector.multi_reduction <add>, %314, %cst_150 [1] : vector<16x32xf32> to vector<16xf32>
    %316 = vector.shape_cast %315 : vector<16xf32> to vector<16x1xf32>
    %cst_151 = arith.constant 3.200000e+01 : f32
    %317 = vector.broadcast %cst_151 : f32 to vector<16x1xf32>
    %318 = arith.divf %316, %317 : vector<16x1xf32>
    %cst_152 = arith.constant 9.99999974E-6 : f32
    %319 = vector.broadcast %cst_152 : f32 to vector<16x1xf32>
    %320 = arith.addf %318, %319 : vector<16x1xf32>
    %321 = math.rsqrt %320 : vector<16x1xf32>
    %322 = vector.broadcast %321 : vector<16x1xf32> to vector<16x32xf32>
    %323 = arith.mulf %313, %322 : vector<16x32xf32>
    %324 = vector.broadcast %305 : vector<1x32xf32> to vector<16x32xf32>
    %325 = arith.mulf %323, %324 : vector<16x32xf32>
    %326 = vector.broadcast %307 : vector<1x32xf32> to vector<16x32xf32>
    %327 = arith.addf %325, %326 : vector<16x32xf32>
    %c0_153 = arith.constant 0 : index
    %c0_154 = arith.constant 0 : index
    %328 = vector.load %arg19[%c0_153, %c0_154] : memref<1x32xf32, #tpu.memory_space<vmem>>, vector<1x32xf32>
    %c0_155 = arith.constant 0 : index
    %c0_156 = arith.constant 0 : index
    %329 = vector.load %arg20[%c0_155, %c0_156] : memref<1x32xf32, #tpu.memory_space<vmem>>, vector<1x32xf32>
    %cst_157 = arith.constant dense<0.000000e+00> : vector<16xf32>
    %330 = vector.multi_reduction <add>, %327, %cst_157 [1] : vector<16x32xf32> to vector<16xf32>
    %331 = vector.shape_cast %330 : vector<16xf32> to vector<16x1xf32>
    %cst_158 = arith.constant 3.200000e+01 : f32
    %332 = vector.broadcast %cst_158 : f32 to vector<16x1xf32>
    %333 = arith.divf %331, %332 : vector<16x1xf32>
    %334 = vector.broadcast %333 : vector<16x1xf32> to vector<16x32xf32>
    %335 = arith.subf %327, %334 : vector<16x32xf32>
    %336 = arith.mulf %335, %335 : vector<16x32xf32>
    %cst_159 = arith.constant dense<0.000000e+00> : vector<16xf32>
    %337 = vector.multi_reduction <add>, %336, %cst_159 [1] : vector<16x32xf32> to vector<16xf32>
    %338 = vector.shape_cast %337 : vector<16xf32> to vector<16x1xf32>
    %cst_160 = arith.constant 3.200000e+01 : f32
    %339 = vector.broadcast %cst_160 : f32 to vector<16x1xf32>
    %340 = arith.divf %338, %339 : vector<16x1xf32>
    %cst_161 = arith.constant 9.99999974E-6 : f32
    %341 = vector.broadcast %cst_161 : f32 to vector<16x1xf32>
    %342 = arith.addf %340, %341 : vector<16x1xf32>
    %343 = math.rsqrt %342 : vector<16x1xf32>
    %344 = vector.broadcast %343 : vector<16x1xf32> to vector<16x32xf32>
    %345 = arith.mulf %335, %344 : vector<16x32xf32>
    %346 = vector.broadcast %328 : vector<1x32xf32> to vector<16x32xf32>
    %347 = arith.mulf %345, %346 : vector<16x32xf32>
    %348 = vector.broadcast %329 : vector<1x32xf32> to vector<16x32xf32>
    %349 = arith.addf %347, %348 : vector<16x32xf32>
    %c0_162 = arith.constant 0 : index
    %c0_163 = arith.constant 0 : index
    %350 = vector.load %arg21[%c0_162, %c0_163] : memref<32x128xf32, #tpu.memory_space<vmem>>, vector<32x128xf32>
    %cst_164 = arith.constant dense<0.000000e+00> : vector<16x128xf32>
    %351 = tpu.matmul %349, %350, %cst_164 {dimension_numbers = #tpu.dot_dimension_numbers<[1], [0], [0], [1], [0, 0, 1, 1], [], []>} : vector<16x32xf32>, vector<32x128xf32>, vector<16x128xf32> -> vector<16x128xf32>
    %c0_165 = arith.constant 0 : index
    %c0_166 = arith.constant 0 : index
    %352 = vector.load %arg22[%c0_165, %c0_166] : memref<1x128xf32, #tpu.memory_space<vmem>>, vector<1x128xf32>
    %353 = vector.broadcast %352 : vector<1x128xf32> to vector<16x128xf32>
    %354 = arith.addf %351, %353 : vector<16x128xf32>
    %355 = arith.negf %354 : vector<16x128xf32>
    %356 = math.exp %355 : vector<16x128xf32>
    %cst_167 = arith.constant 1.000000e+00 : f32
    %357 = vector.broadcast %cst_167 : f32 to vector<16x128xf32>
    %358 = arith.addf %357, %356 : vector<16x128xf32>
    %359 = arith.divf %357, %358 : vector<16x128xf32>
    %c0_168 = arith.constant 0 : index
    %c0_169 = arith.constant 0 : index
    %360 = vector.load %arg23[%c0_168, %c0_169] : memref<16x128xf32, #tpu.memory_space<vmem>>, vector<16x128xf32>
    tpu.vector_store %arg23[%c0_168, %c0_169], %359 {strides = array<i32>} : memref<16x128xf32, #tpu.memory_space<vmem>>, vector<16x128xf32>,
    return
  }
  func.func @transform_0(%arg0: i32) -> (i32, i32) {
    %c0_i32 = arith.constant 0 : i32
    %c0_i32_0 = arith.constant 0 : i32
    return %arg0, %c0_i32 : i32, i32
  }
  func.func @transform_1(%arg0: i32) -> (i32, i32) {
    %c0_i32 = arith.constant 0 : i32
    %c0_i32_0 = arith.constant 0 : i32
    return %arg0, %c0_i32 : i32, i32
  }
  func.func @transform_2(%arg0: i32) -> (i32, i32) {
    %c0_i32 = arith.constant 0 : i32
    %c0_i32_0 = arith.constant 0 : i32
    %c0_i32_1 = arith.constant 0 : i32
    return %c0_i32, %c0_i32_0 : i32, i32
  }
  func.func @transform_3(%arg0: i32) -> (i32, i32) {
    %c0_i32 = arith.constant 0 : i32
    %c0_i32_0 = arith.constant 0 : i32
    %c0_i32_1 = arith.constant 0 : i32
    return %c0_i32, %c0_i32_0 : i32, i32
  }
  func.func @transform_4(%arg0: i32) -> (i32, i32) {
    %c0_i32 = arith.constant 0 : i32
    %c0_i32_0 = arith.constant 0 : i32
    %c0_i32_1 = arith.constant 0 : i32
    return %c0_i32, %c0_i32_0 : i32, i32
  }
  func.func @transform_5(%arg0: i32) -> (i32, i32) {
    %c0_i32 = arith.constant 0 : i32
    %c0_i32_0 = arith.constant 0 : i32
    %c0_i32_1 = arith.constant 0 : i32
    return %c0_i32, %c0_i32_0 : i32, i32
  }
  func.func @transform_6(%arg0: i32) -> (i32, i32, i32) {
    %c0_i32 = arith.constant 0 : i32
    %c0_i32_0 = arith.constant 0 : i32
    %c0_i32_1 = arith.constant 0 : i32
    %c0_i32_2 = arith.constant 0 : i32
    return %c0_i32, %c0_i32_0, %c0_i32_1 : i32, i32, i32
  }
  func.func @transform_7(%arg0: i32) -> (i32, i32, i32) {
    %c0_i32 = arith.constant 0 : i32
    %c0_i32_0 = arith.constant 0 : i32
    %c0_i32_1 = arith.constant 0 : i32
    %c0_i32_2 = arith.constant 0 : i32
    return %c0_i32, %c0_i32_0, %c0_i32_1 : i32, i32, i32
  }
  func.func @transform_8(%arg0: i32) -> (i32, i32, i32) {
    %c0_i32 = arith.constant 0 : i32
    %c0_i32_0 = arith.constant 0 : i32
    %c0_i32_1 = arith.constant 0 : i32
    %c0_i32_2 = arith.constant 0 : i32
    return %c0_i32, %c0_i32_0, %c0_i32_1 : i32, i32, i32
  }
  func.func @transform_9(%arg0: i32) -> (i32, i32, i32) {
    %c0_i32 = arith.constant 0 : i32
    %c0_i32_0 = arith.constant 0 : i32
    %c0_i32_1 = arith.constant 0 : i32
    %c0_i32_2 = arith.constant 0 : i32
    return %c0_i32, %c0_i32_0, %c0_i32_1 : i32, i32, i32
  }
  func.func @transform_10(%arg0: i32) -> (i32, i32, i32) {
    %c0_i32 = arith.constant 0 : i32
    %c0_i32_0 = arith.constant 0 : i32
    %c0_i32_1 = arith.constant 0 : i32
    %c0_i32_2 = arith.constant 0 : i32
    return %c0_i32, %c0_i32_0, %c0_i32_1 : i32, i32, i32
  }
  func.func @transform_11(%arg0: i32) -> (i32, i32, i32) {
    %c0_i32 = arith.constant 0 : i32
    %c0_i32_0 = arith.constant 0 : i32
    %c0_i32_1 = arith.constant 0 : i32
    %c0_i32_2 = arith.constant 0 : i32
    return %c0_i32, %c0_i32_0, %c0_i32_1 : i32, i32, i32
  }
  func.func @transform_12(%arg0: i32) -> (i32, i32, i32) {
    %c0_i32 = arith.constant 0 : i32
    %c0_i32_0 = arith.constant 0 : i32
    %c0_i32_1 = arith.constant 0 : i32
    %c0_i32_2 = arith.constant 0 : i32
    return %c0_i32, %c0_i32_0, %c0_i32_1 : i32, i32, i32
  }
  func.func @transform_13(%arg0: i32) -> (i32, i32, i32) {
    %c0_i32 = arith.constant 0 : i32
    %c0_i32_0 = arith.constant 0 : i32
    %c0_i32_1 = arith.constant 0 : i32
    %c0_i32_2 = arith.constant 0 : i32
    return %c0_i32, %c0_i32_0, %c0_i32_1 : i32, i32, i32
  }
  func.func @transform_14(%arg0: i32) -> (i32, i32, i32) {
    %c0_i32 = arith.constant 0 : i32
    %c0_i32_0 = arith.constant 0 : i32
    %c0_i32_1 = arith.constant 0 : i32
    %c0_i32_2 = arith.constant 0 : i32
    return %c0_i32, %c0_i32_0, %c0_i32_1 : i32, i32, i32
  }
  func.func @transform_15(%arg0: i32) -> (i32, i32, i32) {
    %c0_i32 = arith.constant 0 : i32
    %c0_i32_0 = arith.constant 0 : i32
    %c0_i32_1 = arith.constant 0 : i32
    %c0_i32_2 = arith.constant 0 : i32
    return %c0_i32, %c0_i32_0, %c0_i32_1 : i32, i32, i32
  }
  func.func @transform_16(%arg0: i32) -> (i32, i32, i32) {
    %c0_i32 = arith.constant 0 : i32
    %c0_i32_0 = arith.constant 0 : i32
    %c0_i32_1 = arith.constant 0 : i32
    %c0_i32_2 = arith.constant 0 : i32
    return %c0_i32, %c0_i32_0, %c0_i32_1 : i32, i32, i32
  }
  func.func @transform_17(%arg0: i32) -> (i32, i32, i32) {
    %c0_i32 = arith.constant 0 : i32
    %c0_i32_0 = arith.constant 0 : i32
    %c0_i32_1 = arith.constant 0 : i32
    %c0_i32_2 = arith.constant 0 : i32
    return %c0_i32, %c0_i32_0, %c0_i32_1 : i32, i32, i32
  }
  func.func @transform_18(%arg0: i32) -> (i32, i32) {
    %c0_i32 = arith.constant 0 : i32
    %c0_i32_0 = arith.constant 0 : i32
    %c0_i32_1 = arith.constant 0 : i32
    return %c0_i32, %c0_i32_0 : i32, i32
  }
  func.func @transform_19(%arg0: i32) -> (i32, i32) {
    %c0_i32 = arith.constant 0 : i32
    %c0_i32_0 = arith.constant 0 : i32
    %c0_i32_1 = arith.constant 0 : i32
    return %c0_i32, %c0_i32_0 : i32, i32
  }
  func.func @transform_20(%arg0: i32) -> (i32, i32) {
    %c0_i32 = arith.constant 0 : i32
    %c0_i32_0 = arith.constant 0 : i32
    %c0_i32_1 = arith.constant 0 : i32
    return %c0_i32, %c0_i32_0 : i32, i32
  }
  func.func @transform_21(%arg0: i32) -> (i32, i32) {
    %c0_i32 = arith.constant 0 : i32
    %c0_i32_0 = arith.constant 0 : i32
    %c0_i32_1 = arith.constant 0 : i32
    return %c0_i32, %c0_i32_0 : i32, i32
  }
  func.func @transform_22(%arg0: i32) -> (i32, i32) {
    %c0_i32 = arith.constant 0 : i32
    %c0_i32_0 = arith.constant 0 : i32
    return %arg0, %c0_i32 : i32, i32
  }
}

</mosaic_0001>

<bundles_post_ra>
// kernel: tpu_custom_call.1
= control target key start
LH: loop header
LB: loop body
LE: loop exit
PB: predicated region body
PF: predicated region fallthrough
CT: control target
= control target key end

     0   :  { %s2893_s0 = inlined_call_operand.vmem [shape: s32[16,1], index: 0, kind: input, shape index: {}]   ;;  %s2894_s1 = inlined_call_operand.vmem [shape: f32[16,6], index: 1, kind: input, shape index: {}]   ;;  %s2895_s2 = inlined_call_operand.vmem [shape: f32[16,16], index: 2, kind: input, shape index: {}]   ;;  %s2896_s3 = inlined_call_operand.vmem [shape: f32[6,32], index: 3, kind: input, shape index: {}]   ;;  %s2897_s4 = inlined_call_operand.vmem [shape: f32[1,32], index: 4, kind: input, shape index: {}]   ;;  %s2898_s5 = inlined_call_operand.vmem [shape: f32[120,32], index: 5, kind: input, shape index: {}]   ;;  %s2899_s6 = inlined_call_operand.vmem [shape: f32[2,32,96], index: 6, kind: input, shape index: {}]   ;;  %s2900_s7 = inlined_call_operand.vmem [shape: f32[2,1,96], index: 7, kind: input, shape index: {}]   ;;  %s2901_s8 = inlined_call_operand.vmem [shape: f32[2,32,32], index: 8, kind: input, shape index: {}]   ;;  %s2902_s9 = inlined_call_operand.vmem [shape: f32[2,1,32], index: 9, kind: input, shape index: {}]   ;;  %s2903_s10 = inlined_call_operand.vmem [shape: f32[2,1,32], index: 10, kind: input, shape index: {}]   ;;  %s2904_s11 = inlined_call_operand.vmem [shape: f32[2,1,32], index: 11, kind: input, shape index: {}]   ;;  %s2905_s12 = inlined_call_operand.vmem [shape: f32[2,32,128], index: 12, kind: input, shape index: {}]   ;;  %s2906_s13 = inlined_call_operand.vmem [shape: f32[2,1,128], index: 13, kind: input, shape index: {}]   ;;  %s2907_s14 = inlined_call_operand.vmem [shape: f32[2,128,32], index: 14, kind: input, shape index: {}]   ;;  %s2908_s15 = inlined_call_operand.vmem [shape: f32[2,1,32], index: 15, kind: input, shape index: {}]   ;;  %s2909_s16 = inlined_call_operand.vmem [shape: f32[2,1,32], index: 16, kind: input, shape index: {}]   ;;  %s2910_s17 = inlined_call_operand.vmem [shape: f32[2,1,32], index: 17, kind: input, shape index: {}]   ;;  %s2911_s18 = inlined_call_operand.vmem [shape: f32[1,32], index: 18, kind: input, shape index: {}]   ;;  %s2912_s19 = inlined_call_operand.vmem [shape: f32[1,32], index: 19, kind: input, shape index: {}]   ;;  %s2913_s20 = inlined_call_operand.vmem [shape: f32[32,128], index: 20, kind: input, shape index: {}]   ;;  %s2914_s21 = inlined_call_operand.vmem [shape: f32[1,128], index: 21, kind: input, shape index: {}]   ;;  %s2915_s22 = inlined_call_operand.hbm [shape: f32[16,128], index: 22, kind: output, shape index: {}]  }
   0x1   :  { %2929 = sst [smem:[#allocation5_spill]] %s2893_s0 }
   0x2   :  { %2930 = sst [smem:[#allocation6_spill]] %s2894_s1 }
   0x3   :  { %2931 = sst [smem:[#allocation7_spill]] %s2895_s2 }
   0x4   :  { %2932 = sst [smem:[#allocation8_spill]] %s2896_s3 }
   0x5   :  { %2933 = sst [smem:[#allocation9_spill]] %s2897_s4 }
   0x6   :  { %2934 = sst [smem:[#allocation10_spill]] %s2898_s5 }
   0x7   :  { %2935 = sst [smem:[#allocation11_spill]] %s2899_s6 }
   0x8   :  { %2936 = sst [smem:[#allocation12_spill]] %s2910_s17 }
   0x9   :  { %s2937_s29 = sld [smem:[#allocation5_spill]]  ;;  %vm86_vm0 = vcmask 1045504   ;;  %v2172_v2 = vmov 0   ;;  %vm79_vm1 = vcmask 48128  }
   0xa   :  { %s2938_s17 = sld [smem:[#allocation8_spill]]  ;;  %1989 = vset.pattern.permute.xlu0 %v2172_v2 }
   0xb   :  { %s2939_s1 = sld [smem:[#allocation10_spill]] }
   0xc   :  { %s2940_s2 = sld [smem:[#allocation6_spill]] }
   0xf   :  { %v113_v0 = vld [vmem:[%s2937_s29] sm:$0xff]  ;;  %v114_v7 = vld [vmem:[%s2937_s29 + $0x8] sm:$0xff] }
  0x10   :  { %v74_v1 = vld [vmem:[%s2938_s17] sm:$0x3f]  ;;  %118 = vperm.xlu0 %1989, %v113_v0  }
  0x11   :  { %1849 = vmatpush.msk.msra.mxu1 %vm86_vm0, %v74_v1  ;;  %v143_v3 = vld [vmem:[%s2939_s1 + $0x70] sm:$0xff]  ;;  %v142_v4 = vld [vmem:[%s2939_s1 + $0x68] sm:$0xff]  ;;  %v141_v5 = vld [vmem:[%s2939_s1 + $0x60] sm:$0xff] }
  0x12   :  { %v72_v6 = vld [vmem:[%s2940_s2] sm:$0xff]  ;;  %v140_v8 = vld [vmem:[%s2939_s1 + $0x58] sm:$0xff]  ;;  %v139_v9 = vld [vmem:[%s2939_s1 + $0x50] sm:$0xff] }
  0x13   :  { %152 = vmatpush.msrb.mxu1 %v143_v3  ;;  %v138_v10 = vld [vmem:[%s2939_s1 + $0x48] sm:$0xff]  ;;  %v137_v12 = vld [vmem:[%s2939_s1 + $0x40] sm:$0xff] }
  0x14   :  { %1850 = vmatmul.msk.f32.vlgmr.msra.gmra.mxu1 %vm79_vm1, %v72_v6  ;;  %v73_v11 = vld [vmem:[%s2940_s2 + $0x8] sm:$0xff] }
  0x15   :  { %153 = vmatpush.msrb.mxu1 %v142_v4 }
  0x17   :  { %154 = vmatpush.msrb.mxu1 %v141_v5 }
  0x18   :  { %121 = vperm.xlu0 %1989, %v114_v7  }
  0x19   :  { %155 = vmatpush.msrb.mxu1 %v140_v8 }
  0x1b   :  { %156 = vmatpush.msrb.mxu1 %v139_v9 }
  0x1d   :  { %157 = vmatpush.msrb.mxu1 %v138_v10 }
  0x1e   :  { %27 = vsyncpa [#allocation3], 0  ;;  %v136_v13 = vld [vmem:[%s2939_s1 + $0x38] sm:$0xff]  ;;  %1851 = vmatmul.msk.f32.gmra.mxu1 %vm79_vm1, %v73_v11  ;;  %v135_v14 = vld [vmem:[%s2939_s1 + $0x30] sm:$0xff]  ;;  %s2941_s3 = sld [smem:[#allocation11_spill]]  ;;  %v115_v23 = vlaneseq  ;;  %vm144_vm2 = vcmask 982016  }
  0x1f   :  { %158 = vmatpush.msrb.mxu1 %v137_v12  ;;  %v134_v15 = vld [vmem:[%s2939_s1 + $0x28] sm:$0xff]  ;;  %v133_v16 = vld [vmem:[%s2939_s1 + $0x20] sm:$0xff]  ;;  %v132_v17 = vld [vmem:[%s2939_s1 + $0x18] sm:$0xff]  ;;  %v2173_v26 = vmov 0.0   ;;  %s2942_s24 = sld [smem:[#allocation9_spill]]  ;;  %vm186_vm5 = vcmask 261120  }
  0x20   :  { %v131_v18 = vld [vmem:[%s2939_s1 + $0x10] sm:$0xff]  ;;  %v130_v19 = vld [vmem:[%s2939_s1 + $0x8] sm:$0xff]  ;;  %v129_v20 = vld [vmem:[%s2939_s1] sm:$0xff]  ;;  %v116_v24 = vand.u32 127, %v115_v23  ;;  %s2174_s25 = smov 120   ;;  %s2175_s17 = smov 88  }
  0x21   :  { %159 = vmatpush.msrb.mxu1 %v136_v13  ;;  %v2031_v41 = vld [vmem:[%s2900_s7] ss:$0 sm:$0xff]  ;;  %s2176_s26 = smov 96   ;;  %vm226_vm6 = vcmask 64512   ;;  %s2943_s28 = sld [smem:[#allocation7_spill]]  ;;  %vm258_vm7 = vcmask 130048  }
  0x22   :  { %s2177_s4 = smov 64   ;;  %s2924_s0 = smov 56  }
  0x23   :  { %160 = vmatpush.msrb.mxu1 %v135_v14  ;;  %s2179_s23 = smov 80   ;;  %s2927_s5 = smov 104  }
  0x24   :  { %v181_v21 = vld [vmem:[%s2941_s3 + $0x18] sm:$0xff]  ;;  %v180_v22 = vld [vmem:[%s2941_s3 + $0x10] sm:$0xff]  ;;  %v179_v30 = vld [vmem:[%s2941_s3 + $0x8] sm:$0xff]  ;;  %s2182_s6 = smov 72   ;;  %s2922_s30 = smov 40  }
  0x25   :  { %161 = vmatpush.msrb.mxu1 %v134_v15  ;;  %205 = vmatpush.msra.mxu0 %v181_v21  ;;  %v178_v31 = vld [vmem:[%s2941_s3] sm:$0xff]  ;;  %s2923_s29 = smov 48   ;;  %s2944_s27 = sld [smem:[#allocation12_spill]] }
  0x26   :  { %v2030_v34 = vld [vmem:[%s2942_s24] ss:$0 sm:$0xff]  ;;  %s2925_s24 = smov 112  }
  0x27   :  { %162 = vmatpush.msrb.mxu1 %v133_v16  ;;  %206 = vmatpush.msra.mxu0 %v180_v22  ;;  %v2421_v52 = vld [vmem:[%s2943_s28] sm:$0xff]  ;;  %v2428_v56 = vld [vmem:[%s2943_s28 + $0x8] sm:$0xff] }
  0x29   :  { %163 = vmatpush.msrb.mxu1 %v132_v17  ;;  %207 = vmatpush.msra.mxu0 %v179_v30 }
  0x2b   :  { %164 = vmatpush.msrb.mxu1 %v131_v18  ;;  %208 = vmatpush.msra.mxu0 %v178_v31 }
  0x2d   :  { %165 = vmatpush.msrb.mxu1 %v130_v19 }
  0x2f   :  { %166 = vmatpush.msrb.mxu1 %v129_v20 }
  0x31   :  { %1968 = vmatpush.msra.mxu1 %v181_v21 }
  0x33   :  { %1969 = vmatpush.msra.mxu1 %v180_v22 }
  0x35   :  { %1970 = vmatpush.msra.mxu1 %v179_v30 }
  0x37   :  { %1971 = vmatpush.msra.mxu1 %v178_v31 }
  0x82   :  { %v119_v25 = vpop.permute.xlu0 %118 }
  0x83   :  { %vm123_vm3 = vcmp.eq.s32.totalorder %v116_v24, %v119_v25 }
  0x84   :  { %v1852_v27 = vsel %vm123_vm3, 1.0, %v2173_v26 }
  0x85   :  { %1854 = vmatmul.msk.f32.vlgmr.msrb.gmra.mxu1 %vm144_vm2, %v1852_v27 }
  0x8a   :  { %v122_v28 = vpop.permute.xlu0 %121 }
  0x8b   :  { %vm124_vm4 = vcmp.eq.s32.totalorder %v116_v24, %v122_v28 }
  0x8c   :  { %v1853_v29 = vsel %vm124_vm4, 1.0, %v2173_v26 }
  0x8d   :  { %1855 = vmatmul.msk.f32.gmra.mxu1 %vm144_vm2, %v1853_v29 }
  0x91   :  { %v107_v32 = vpop.f32.mrf.mxu1 }
  0x92   :  { %v108_v35 = vadd.f32 %v2030_v34, %v107_v32 }
  0x9b   :  { %v110_v33 = vpop.f32.mrf.mxu1 }
  0x9c   :  { %v111_v38 = vadd.f32 %v2030_v34, %v110_v33 }
 0x102   :  { %v168_v36 = vpop.f32.mrf.mxu1 }
 0x103   :  { %v2381_v37 = vadd.f32 %v168_v36, %v108_v35 }
 0x105   :  { %1856 = vmatmul.msk.f32.vlgmr.msra.gmra.mxu0 %vm186_vm5, %v2381_v37 }
 0x10a   :  { %v171_v39 = vpop.f32.mrf.mxu1 }
 0x10b   :  { %v2385_v40 = vadd.f32 %v171_v39, %v111_v38  ;;  %v216_v39 = vld [vmem:[%s2901_s8] sm:$0xff] }
 0x10d   :  { %1857 = vmatmul.msk.f32.vlgmr.msra.gmra.mxu1 %vm186_vm5, %v2385_v40 }
 0x182   :  { %v210_v42 = vpop.f32.mrf.mxu0 }
 0x183   :  { %v2392_v43 = vadd.f32 %v2031_v41, %v210_v42 }
 0x185   :  { %316 = vrot.lane.b32.xlu0 %v2392_v43, %s2174_s25 }
 0x18a   :  { %v213_v44 = vpop.f32.mrf.mxu1 }
 0x18b   :  { %v2396_v45 = vadd.f32 %v2031_v41, %v213_v44 }
 0x18d   :  { %322 = vrot.lane.b32.xlu2 %v2396_v45, %s2175_s17  ;;  %224 = vrot.lane.b32.xlu1 %v2396_v45, %s2176_s26  ;;  %v2434_v60 = vpack.i.bf16 %v2392_v43, %v2396_v45 }
 0x195   :  { %320 = vrot.lane.b32.xlu2 %v2392_v43, %s2175_s17  ;;  %222 = vrot.lane.b32.xlu1 %v2392_v43, %s2176_s26 }
 0x19d   :  { %318 = vrot.lane.b32.xlu1 %v2396_v45, %s2174_s25 }
 0x1e7   :  { %v323_v46 = vpop.permute.xlu2 %322 }
 0x1e8   :  { %1864 = vmatpush.xpose.msk.msra.mxu2 %vm226_vm6, %v323_v46 }
 0x1ef   :  { %v321_v47 = vpop.permute.xlu2 %320 }
 0x1f0   :  { %1865 = vmatpush.xpose.msk.msra.mxu2 %vm226_vm6, %v321_v47 }
 0x1f4   :  { %462 = vmatpush.msrb.mxu2 %v216_v39 }
 0x1f7   :  { %v317_v48 = vpop.permute.xlu0 %316 }
 0x1f8   :  { %1866 = vmatmul.msk.f32.vlgmr.msra.gmra.mxu2 %vm226_vm6, %v317_v48 }
 0x1ff   :  { %v225_v49 = vpop.permute.xlu1 %224 }
 0x200   :  { %1858 = vmatpush.xpose.msk.msra.mxu3 %vm226_vm6, %v225_v49 }
 0x207   :  { %v223_v50 = vpop.permute.xlu1 %222 }
 0x208   :  { %1859 = vmatpush.xpose.msk.msra.mxu3 %vm226_vm6, %v223_v50 }
 0x20b   :  { %1860 = vmatmul.msk.f32.vlgmr.msra.gmra.mxu3 %vm226_vm6, %v2392_v43 }
 0x20f   :  { %v319_v51 = vpop.permute.xlu1 %318 }
 0x210   :  { %1867 = vmatmul.msk.f32.gmra.mxu2 %vm226_vm6, %v319_v51 }
 0x213   :  { %1861 = vmatmul.msk.f32.gmra.mxu3 %vm226_vm6, %v2396_v45 }
 0x27b   :  { %v349_v8 = vpop.f32.mrf.mxu2 }
 0x27c   :  { %v350_v9 = vadd.f32 %v349_v8, %v2421_v52 }
 0x27e   :  { %v355_v14 = vsel %vm258_vm7, %v350_v9, -inf }
 0x28e   :  { %v252_v53 = vpop.f32.mrf.mxu3 }
 0x28f   :  { %v253_v54 = vadd.f32 %v252_v53, %v2421_v52 }
 0x291   :  { %v259_v55 = vsel %vm258_vm7, %v253_v54, -inf }
 0x292   :  { %260 = vmax.xlane.f32.xlu2 %v259_v55  ;;  %v217_v55 = vld [vmem:[%s2901_s8 + $0x8] sm:$0xff] }
 0x293   :  { %v352_v16 = vpop.f32.mrf.mxu2 }
 0x294   :  { %v353_v17 = vadd.f32 %v352_v16, %v2428_v56 }
 0x296   :  { %v255_v57 = vpop.f32.mrf.mxu3  ;;  %v358_v19 = vsel %vm258_vm7, %v353_v17, -inf }
 0x297   :  { %v256_v58 = vadd.f32 %v255_v57, %v2428_v56 }
 0x299   :  { %v262_v59 = vsel %vm258_vm7, %v256_v58, -inf }
 0x29a   :  { %263 = vmax.xlane.f32.xlu0 %v262_v59 }
 0x2aa   :  { %1991 = vrot.lane.b32.xlu2 %v2434_v60, %s2177_s4 }
 0x2b2   :  { %1996 = vrot.lane.b32.xlu2 %v2434_v60, %s2924_s0 }
 0x2ba   :  { %476 = vrot.lane.b32.xlu2 %v2396_v45, %s2179_s23 }
 0x2c2   :  { %597 = vrot.lane.b32.xlu2 %v2392_v43, %s2927_s5 }
 0x2ca   :  { %474 = vrot.lane.b32.xlu2 %v2392_v43, %s2179_s23 }
 0x2d2   :  { %472 = vrot.lane.b32.xlu2 %v2396_v45, %s2925_s24 }
 0x305   :  { %v261_v61 = vpop.xlane.xlu2 %260 }
 0x306   :  { %v265_v62 = vsub.f32 %v253_v54, %v261_v61 }
 0x308   :  { %v267_v63 = vmul.f32 1.442695, %v265_v62 }
 0x30a   :  { %2050 = vpow2.f32 %v267_v63 }
 0x30d   :  { %v264_v0 = vpop.xlane.xlu0 %263  ;;  %v1992_v1 = vpop.permute.xlu2 %1991 }
 0x30e   :  { %v266_v2 = vsub.f32 %v256_v58, %v264_v0  ;;  %v1993_v3 = vunpack.i.l.bf16 %v1992_v1  ;;  %v1994_v6 = vunpack.i.h.bf16 %v1992_v1 }
 0x310   :  { %v2051_v4 = vpop.eup %2050  ;;  %v269_v5 = vmul.f32 1.442695, %v266_v2  ;;  %307 = vmatpush.msrb.mxu0 %v1993_v3 }
 0x311   :  { %v271_v7 = vsel %vm258_vm7, %v2051_v4, 0.0 }
 0x312   :  { %2052 = vpow2.f32 %v269_v5  ;;  %272 = vadd.xlane.f32.xlu1 %v271_v7  ;;  %308 = vmatpush.msrb.mxu0 %v1994_v6 }
 0x314   :  { %433 = vmatpush.msra.mxu0 %v217_v55 }
 0x315   :  { %v1997_v10 = vpop.permute.xlu2 %1996 }
 0x316   :  { %v1998_v11 = vunpack.i.l.bf16 %v1997_v10  ;;  %v1999_v15 = vunpack.i.h.bf16 %v1997_v10 }
 0x318   :  { %v2053_v12 = vpop.eup %2052  ;;  %403 = vmatpush.msrb.mxu3 %v1998_v11 }
 0x319   :  { %v274_v13 = vsel %vm258_vm7, %v2053_v12, 0.0 }
 0x31a   :  { %275 = vadd.xlane.f32.xlu0 %v274_v13  ;;  %356 = vmax.xlane.f32.xlu1 %v355_v14 }
 0x31b   :  { %404 = vmatpush.msrb.mxu3 %v1999_v15 }
 0x31d   :  { %v477_v18 = vpop.permute.xlu2 %476 }
 0x31e   :  { %1874 = vmatpush.xpose.msk.msra.mxu3 %vm226_vm6, %v477_v18 }
 0x322   :  { %359 = vmax.xlane.f32.xlu0 %v358_v19 }
 0x325   :  { %v598_v20 = vpop.permute.xlu2 %597 }
 0x32d   :  { %v475_v21 = vpop.permute.xlu2 %474 }
 0x32e   :  { %1875 = vmatpush.xpose.msk.msra.mxu3 %vm226_vm6, %v475_v21 }
 0x335   :  { %v473_v54 = vpop.permute.xlu2 %472 }
 0x336   :  { %601 = vrot.lane.b32.xlu0 %v2392_v43, %s2182_s6 }
 0x385   :  { %v273_v22 = vpop.xlane.xlu1 %272 }
 0x386   :  { %2054 = vrcp.f32 %v273_v22 }
 0x38c   :  { %v2055_v23 = vpop.eup %2054 }
 0x38d   :  { %v276_v24 = vpop.xlane.xlu0 %275  ;;  %v357_v25 = vpop.xlane.xlu1 %356  ;;  %v279_v26 = vmul.f32 %v2055_v23, %v2051_v4 }
 0x38e   :  { %2056 = vrcp.f32 %v276_v24  ;;  %v361_v27 = vsub.f32 %v350_v9, %v357_v25 }
 0x38f   :  { %1862 = vmatmul.msk.f32.vlgmr.msrb.gmra.mxu0 %vm258_vm7, %v279_v26 }
 0x390   :  { %v363_v28 = vmul.f32 1.442695, %v361_v27 }
 0x392   :  { %2058 = vpow2.f32 %v363_v28 }
 0x394   :  { %v2057_v29 = vpop.eup %2056 }
 0x395   :  { %v360_v30 = vpop.xlane.xlu0 %359  ;;  %v280_v31 = vmul.f32 %v2057_v29, %v2053_v12 }
 0x396   :  { %v362_v32 = vsub.f32 %v353_v17, %v360_v30 }
 0x397   :  { %1863 = vmatmul.msk.f32.gmra.mxu0 %vm258_vm7, %v280_v31 }
 0x398   :  { %v2059_v33 = vpop.eup %2058  ;;  %v365_v34 = vmul.f32 1.442695, %v362_v32 }
 0x399   :  { %v367_v35 = vsel %vm258_vm7, %v2059_v33, 0.0 }
 0x39a   :  { %2060 = vpow2.f32 %v365_v34  ;;  %368 = vadd.xlane.f32.xlu1 %v367_v35 }
 0x3a0   :  { %v2061_v36 = vpop.eup %2060 }
 0x3a1   :  { %v370_v38 = vsel %vm258_vm7, %v2061_v36, 0.0 }
 0x3a2   :  { %371 = vadd.xlane.f32.xlu0 %v370_v38 }
 0x3a8   :  { %v602_v42 = vpop.permute.xlu0 %601 }
 0x3b3   :  { %603 = vrot.lane.b32.xlu1 %v2396_v45, %s2182_s6 }
 0x3b6   :  { %599 = vrot.lane.b32.xlu0 %v2396_v45, %s2927_s5 }
 0x3bb   :  { %470 = vrot.lane.b32.xlu1 %v2392_v43, %s2925_s24  ;;  %s2187_s24 = smov 128  }
 0x40c   :  { %v310_v41 = vpop.f32.mrf.mxu0 }
 0x40d   :  { %1872 = vmatmul.msk.f32.vlgmr.msrb.gmra.mxu2 %vm226_vm6, %v310_v41  ;;  %v369_v44 = vpop.xlane.xlu1 %368 }
 0x40e   :  { %2062 = vrcp.f32 %v369_v44 }
 0x414   :  { %v2063_v46 = vpop.eup %2062  ;;  %v313_v47 = vpop.f32.mrf.mxu0 }
 0x415   :  { %v372_v48 = vpop.xlane.xlu0 %371  ;;  %1873 = vmatmul.msk.f32.gmra.mxu2 %vm226_vm6, %v313_v47  ;;  %v375_v45 = vmul.f32 %v2063_v46, %v2059_v33 }
 0x416   :  { %2064 = vrcp.f32 %v372_v48 }
 0x417   :  { %1868 = vmatmul.msk.f32.vlgmr.msrb.gmra.mxu3 %vm258_vm7, %v375_v45 }
 0x41c   :  { %v2065_v43 = vpop.eup %2064 }
 0x41d   :  { %v376_v49 = vmul.f32 %v2065_v43, %v2061_v36 }
 0x41f   :  { %1869 = vmatmul.msk.f32.gmra.mxu3 %vm258_vm7, %v376_v49  ;;  %v218_v49 = vld [vmem:[%s2901_s8 + $0x10] sm:$0xff] }
 0x420   :  { %587 = vmatpush.msrb.mxu0 %v218_v49 }
 0x425   :  { %v604_v50 = vpop.permute.xlu1 %603 }
 0x426   :  { %1882 = vmatpush.xpose.msk.msra.mxu2 %vm226_vm6, %v604_v50  ;;  %v219_v50 = vld [vmem:[%s2901_s8 + $0x18] sm:$0xff] }
 0x428   :  { %v600_v53 = vpop.permute.xlu0 %599 }
 0x42a   :  { %1883 = vmatpush.xpose.msk.msra.mxu2 %vm226_vm6, %v602_v42 }
 0x42d   :  { %1884 = vmatmul.msk.f32.vlgmr.msra.gmra.mxu2 %vm226_vm6, %v598_v20  ;;  %v471_v51 = vpop.permute.xlu1 %470 }
 0x42e   :  { %1876 = vmatmul.msk.f32.vlgmr.msra.gmra.mxu3 %vm226_vm6, %v471_v51 }
 0x435   :  { %1885 = vmatmul.msk.f32.gmra.mxu2 %vm226_vm6, %v600_v53 }
 0x436   :  { %1877 = vmatmul.msk.f32.gmra.mxu3 %vm226_vm6, %v473_v54 }
 0x490   :  { %v2485_v58 = vpop.f32.mrf.mxu2 }
 0x498   :  { %v2488_v61 = vpop.f32.mrf.mxu2 }
 0x49a   :  { %v406_v57 = vpop.f32.mrf.mxu3 }
 0x49b   :  { %1870 = vmatmul.msk.f32.vlgmr.msra.gmra.mxu0 %vm226_vm6, %v406_v57 }
 0x4a2   :  { %v409_v59 = vpop.f32.mrf.mxu3 }
 0x4a3   :  { %1871 = vmatmul.msk.f32.gmra.mxu0 %vm226_vm6, %v409_v59 }
 0x4b0   :  { %v630_v62 = vpop.f32.mrf.mxu2 }
 0x4b1   :  { %v631_v63 = vadd.f32 %v630_v62, %v2421_v52  ;;  %v503_v0 = vpop.f32.mrf.mxu3 }
 0x4b2   :  { %v504_v1 = vadd.f32 %v503_v0, %v2421_v52 }
 0x4b3   :  { %v636_v2 = vsel %vm258_vm7, %v631_v63, -inf }
 0x4b4   :  { %637 = vmax.xlane.f32.xlu1 %v636_v2  ;;  %v509_v3 = vsel %vm258_vm7, %v504_v1, -inf  ;;  %v2032_v2 = vld [vmem:[%s2902_s9] ss:$0 sm:$0xff] }
 0x4b5   :  { %510 = vmax.xlane.f32.xlu0 %v509_v3 }
 0x4b8   :  { %v633_v4 = vpop.f32.mrf.mxu2 }
 0x4b9   :  { %v634_v5 = vadd.f32 %v633_v4, %v2428_v56  ;;  %v506_v6 = vpop.f32.mrf.mxu3 }
 0x4ba   :  { %v507_v7 = vadd.f32 %v506_v6, %v2428_v56 }
 0x4bb   :  { %v639_v8 = vsel %vm258_vm7, %v634_v5, -inf }
 0x4bc   :  { %640 = vmax.xlane.f32.xlu2 %v639_v8  ;;  %v512_v9 = vsel %vm258_vm7, %v507_v7, -inf }
 0x4bd   :  { %513 = vmax.xlane.f32.xlu1 %v512_v9 }
 0x4d6   :  { %2001 = vrot.lane.b32.xlu1 %v2434_v60, %s2922_s30 }
 0x518   :  { %v435_v57 = vpop.f32.mrf.mxu0 }
 0x519   :  { %v465_v62 = vadd.f32 %v2485_v58, %v435_v57 }
 0x520   :  { %v438_v59 = vpop.f32.mrf.mxu0 }
 0x527   :  { %v638_v10 = vpop.xlane.xlu1 %637 }
 0x528   :  { %v642_v11 = vsub.f32 %v631_v63, %v638_v10  ;;  %v511_v12 = vpop.xlane.xlu0 %510 }
 0x529   :  { %v515_v13 = vsub.f32 %v504_v1, %v511_v12 }
 0x52a   :  { %v644_v14 = vmul.f32 1.442695, %v642_v11 }
 0x52b   :  { %v517_v15 = vmul.f32 1.442695, %v515_v13 }
 0x52c   :  { %2066 = vpow2.f32 %v644_v14  ;;  %v2185_v14 = vmov 32.0  }
 0x52d   :  { %2068 = vpow2.f32 %v517_v15 }
 0x52f   :  { %v641_v16 = vpop.xlane.xlu2 %640 }
 0x530   :  { %v643_v17 = vsub.f32 %v634_v5, %v641_v16  ;;  %v514_v18 = vpop.xlane.xlu1 %513 }
 0x531   :  { %v516_v21 = vsub.f32 %v507_v7, %v514_v18  ;;  %v468_v7 = vadd.f32 %v2488_v61, %v438_v59  ;;  %v841_v59 = vld [vmem:[%s2907_s14 + $0x38] sm:$0xff] }
 0x532   :  { %v2067_v19 = vpop.eup %2066  ;;  %v646_v20 = vmul.f32 1.442695, %v643_v17 }
 0x533   :  { %v2069_v22 = vpop.eup %2068  ;;  %v648_v23 = vsel %vm258_vm7, %v2067_v19, 0.0  ;;  %v519_v25 = vmul.f32 1.442695, %v516_v21 }
 0x534   :  { %2070 = vpow2.f32 %v646_v20  ;;  %649 = vadd.xlane.f32.xlu0 %v648_v23  ;;  %v521_v24 = vsel %vm258_vm7, %v2069_v22, 0.0 }
 0x535   :  { %522 = vadd.xlane.f32.xlu2 %v521_v24  ;;  %2072 = vpow2.f32 %v519_v25 }
 0x53a   :  { %v2071_v26 = vpop.eup %2070 }
 0x53b   :  { %v651_v27 = vsel %vm258_vm7, %v2071_v26, 0.0  ;;  %v2073_v28 = vpop.eup %2072 }
 0x53c   :  { %652 = vadd.xlane.f32.xlu0 %v651_v27  ;;  %v524_v29 = vsel %vm258_vm7, %v2073_v28, 0.0 }
 0x544   :  { %525 = vadd.xlane.f32.xlu0 %v524_v29  ;;  %v797_v29 = vld [vmem:[%s2905_s12 + $0x10] sm:$0xff] }
 0x548   :  { %v2002_v30 = vpop.permute.xlu1 %2001 }
 0x549   :  { %v2003_v31 = vunpack.i.l.bf16 %v2002_v30  ;;  %v2004_v32 = vunpack.i.h.bf16 %v2002_v30  ;;  %v796_v30 = vld [vmem:[%s2905_s12 + $0x8] sm:$0xff] }
 0x54b   :  { %684 = vmatpush.msrb.mxu3 %v2003_v31  ;;  %v795_v31 = vld [vmem:[%s2905_s12] sm:$0xff] }
 0x54d   :  { %2006 = vrot.lane.b32.xlu2 %v2434_v60, %s2923_s29  ;;  %685 = vmatpush.msrb.mxu3 %v2004_v32 }
 0x5a7   :  { %v650_v33 = vpop.xlane.xlu0 %649 }
 0x5a8   :  { %2074 = vrcp.f32 %v650_v33  ;;  %v523_v34 = vpop.xlane.xlu2 %522 }
 0x5a9   :  { %2076 = vrcp.f32 %v523_v34 }
 0x5ae   :  { %v2075_v35 = vpop.eup %2074 }
 0x5af   :  { %v656_v36 = vmul.f32 %v2075_v35, %v2067_v19  ;;  %v653_v38 = vpop.xlane.xlu0 %652  ;;  %v2077_v41 = vpop.eup %2076  ;;  %v849_v35 = vld [vmem:[%s2907_s14 + $0x78] sm:$0xff] }
 0x5b0   :  { %2078 = vrcp.f32 %v653_v38  ;;  %v2007_v39 = vpop.permute.xlu2 %2006  ;;  %v529_v46 = vmul.f32 %v2077_v41, %v2069_v22  ;;  %850 = vmatpush.msrb.mxu2 %v849_v35  ;;  %v847_v38 = vld [vmem:[%s2907_s14 + $0x68] sm:$0xff] }
 0x5b1   :  { %v2008_v42 = vunpack.i.l.bf16 %v2007_v39  ;;  %1886 = vmatmul.msk.f32.vlgmr.msrb.gmra.mxu3 %vm258_vm7, %v656_v36  ;;  %v2009_v44 = vunpack.i.h.bf16 %v2007_v39  ;;  %v848_v36 = vld [vmem:[%s2907_s14 + $0x70] sm:$0xff] }
 0x5b2   :  { %851 = vmatpush.msrb.mxu2 %v848_v36 }
 0x5b3   :  { %557 = vmatpush.msrb.mxu1 %v2008_v42 }
 0x5b4   :  { %852 = vmatpush.msrb.mxu2 %v847_v38 }
 0x5b5   :  { %558 = vmatpush.msrb.mxu1 %v2009_v44 }
 0x5b6   :  { %v2079_v47 = vpop.eup %2078  ;;  %1878 = vmatmul.msk.f32.vlgmr.msrb.gmra.mxu1 %vm258_vm7, %v529_v46  ;;  %v846_v46 = vld [vmem:[%s2907_s14 + $0x60] sm:$0xff] }
 0x5b7   :  { %v526_v60 = vpop.xlane.xlu0 %525  ;;  %v657_v48 = vmul.f32 %v2079_v47, %v2071_v26  ;;  %714 = vmatpush.msra.mxu1 %v219_v50  ;;  %853 = vmatpush.msrb.mxu2 %v846_v46  ;;  %v843_v50 = vld [vmem:[%s2907_s14 + $0x48] sm:$0xff]  ;;  %v1894_v46 = vld [vmem:[%s2941_s3 + $0x30] sm:$0xff] }
 0x5b8   :  { %2080 = vrcp.f32 %v526_v60 }
 0x5b9   :  { %1887 = vmatmul.msk.f32.gmra.mxu3 %vm258_vm7, %v657_v48  ;;  %2082 = vrcp.f32 %v2185_v14  ;;  %v845_v48 = vld [vmem:[%s2907_s14 + $0x58] sm:$0xff]  ;;  %v836_v14 = vld [vmem:[%s2907_s14 + $0x10] sm:$0xff] }
 0x5ba   :  { %854 = vmatpush.msrb.mxu2 %v845_v48 }
 0x5be   :  { %v2081_v45 = vpop.eup %2080 }
 0x5bf   :  { %v530_v43 = vmul.f32 %v2081_v45, %v2073_v28  ;;  %v2083_v15 = vpop.eup %2082  ;;  %v798_v28 = vld [vmem:[%s2905_s12 + $0x18] sm:$0xff] }
 0x5c0   :  { %v741_v16 = vmul.f32 32.0, %v2083_v15  ;;  %vm745_vm8 = vweird.f32 %v2083_v15  ;;  %821 = vmatpush.msra.mxu0 %v798_v28 }
 0x5c1   :  { %1879 = vmatmul.msk.f32.gmra.mxu1 %vm258_vm7, %v530_v43  ;;  %v844_v43 = vld [vmem:[%s2907_s14 + $0x50] sm:$0xff] }
 0x5c2   :  { %822 = vmatpush.msra.mxu0 %v797_v29  ;;  %855 = vmatpush.msrb.mxu2 %v844_v43 }
 0x5c4   :  { %823 = vmatpush.msra.mxu0 %v796_v30  ;;  %856 = vmatpush.msrb.mxu2 %v843_v50 }
 0x5c6   :  { %824 = vmatpush.msra.mxu0 %v795_v31 }
 0x633   :  { %v560_v51 = vpop.f32.mrf.mxu1 }
 0x634   :  { %1880 = vmatmul.msk.f32.vlgmr.msrb.gmra.mxu0 %vm226_vm6, %v560_v51  ;;  %v687_v53 = vpop.f32.mrf.mxu3 }
 0x635   :  { %1888 = vmatmul.msk.f32.vlgmr.msra.gmra.mxu1 %vm226_vm6, %v687_v53  ;;  %v842_v53 = vld [vmem:[%s2907_s14 + $0x40] sm:$0xff] }
 0x636   :  { %857 = vmatpush.msrb.mxu2 %v842_v53 }
 0x638   :  { %858 = vmatpush.msrb.mxu2 %v841_v59 }
 0x63c   :  { %v690_v54 = vpop.f32.mrf.mxu3 }
 0x63d   :  { %1889 = vmatmul.msk.f32.gmra.mxu1 %vm226_vm6, %v690_v54  ;;  %v2033_v54 = vld [vmem:[%s2903_s10] ss:$0 sm:$0xff] }
 0x63e   :  { %v563_v55 = vpop.f32.mrf.mxu1 }
 0x63f   :  { %1881 = vmatmul.msk.f32.gmra.mxu0 %vm226_vm6, %v563_v55 }
 0x6b1   :  { %v589_v63 = vpop.f32.mrf.mxu0 }
 0x6b2   :  { %v595_v0 = vadd.f32 %v589_v63, %v465_v62  ;;  %v716_v1 = vpop.f32.mrf.mxu1 }
 0x6b4   :  { %v722_v3 = vadd.f32 %v716_v1, %v595_v0  ;;  %v2034_v0 = vld [vmem:[%s2904_s11] ss:$0 sm:$0xff]  ;;  %v840_v1 = vld [vmem:[%s2907_s14 + $0x30] sm:$0xff] }
 0x6b5   :  { %859 = vmatpush.msrb.mxu2 %v840_v1 }
 0x6b6   :  { %v728_v4 = vadd.f32 %v2032_v2, %v722_v3 }
 0x6b8   :  { %v730_v5 = vadd.f32 %v728_v4, %v2381_v37  ;;  %v742_v37 = vsub.f32 1.0, %v741_v16  ;;  %v839_v4 = vld [vmem:[%s2907_s14 + $0x28] sm:$0xff]  ;;  %v834_v16 = vld [vmem:[%s2907_s14] sm:$0xff] }
 0x6b9   :  { %860 = vmatpush.msrb.mxu2 %v839_v4  ;;  %v2038_v4 = vld [vmem:[%s2944_s27] ss:$0 sm:$0xff] }
 0x6ba   :  { %v734_v6 = vsel %vm186_vm5, %v730_v5, 0.0  ;;  %v719_v10 = vpop.f32.mrf.mxu1  ;;  %v743_v17 = vmul.f32 %v2083_v15, %v742_v37  ;;  %v2035_v37 = vld [vmem:[%s2906_s13] ss:$0 sm:$0xff] }
 0x6bb   :  { %735 = vadd.xlane.f32.xlu0 %v734_v6 }
 0x6bc   :  { %v592_v8 = vpop.f32.mrf.mxu0  ;;  %v744_v18 = vadd.f32 %v2083_v15, %v743_v17 }
 0x6bd   :  { %v596_v9 = vadd.f32 %v592_v8, %v468_v7  ;;  %v838_v7 = vld [vmem:[%s2907_s14 + $0x20] sm:$0xff] }
 0x6be   :  { %v2529_v61 = vsel %vm745_vm8, %v2083_v15, %v744_v18  ;;  %861 = vmatpush.msrb.mxu2 %v838_v7  ;;  %v835_v15 = vld [vmem:[%s2907_s14 + $0x8] sm:$0xff] }
 0x6bf   :  { %v723_v58 = vadd.f32 %v719_v10, %v596_v9  ;;  %v837_v9 = vld [vmem:[%s2907_s14 + $0x18] sm:$0xff] }
 0x6c0   :  { %862 = vmatpush.msrb.mxu2 %v837_v9 }
 0x6c1   :  { %v729_v11 = vadd.f32 %v2032_v2, %v723_v58 }
 0x6c2   :  { %863 = vmatpush.msrb.mxu2 %v836_v14  ;;  %v2039_v14 = vld [vmem:[%s2900_s7 + $0x1] ss:$0 sm:$0xff]  ;;  %s2945_s7 = smov 104  }
 0x6c3   :  { %v731_v12 = vadd.f32 %v729_v11, %v2385_v40 }
 0x6c4   :  { %864 = vmatpush.msrb.mxu2 %v835_v15 }
 0x6c5   :  { %v737_v13 = vsel %vm186_vm5, %v731_v12, 0.0 }
 0x6c6   :  { %738 = vadd.xlane.f32.xlu1 %v737_v13  ;;  %865 = vmatpush.msrb.mxu2 %v834_v16 }
 0x72e   :  { %v736_v19 = vpop.xlane.xlu0 %735 }
 0x72f   :  { %v747_v20 = vmul.f32 %v2529_v61, %v736_v19 }
 0x731   :  { %v749_v21 = vsub.f32 %v730_v5, %v747_v20 }
 0x733   :  { %v751_v22 = vmul.f32 %v749_v21, %v749_v21 }
 0x735   :  { %v753_v40 = vsel %vm186_vm5, %v751_v22, 0.0 }
 0x736   :  { %754 = vadd.xlane.f32.xlu0 %v753_v40  ;;  %v2036_v40 = vld [vmem:[%s2908_s15] ss:$0 sm:$0xff] }
 0x739   :  { %v739_v23 = vpop.xlane.xlu1 %738 }
 0x73a   :  { %v748_v24 = vmul.f32 %v2529_v61, %v739_v23 }
 0x73c   :  { %v2534_v25 = vsub.f32 %v731_v12, %v748_v24 }
 0x73e   :  { %v752_v26 = vmul.f32 %v2534_v25, %v2534_v25 }
 0x740   :  { %v756_v27 = vsel %vm186_vm5, %v752_v26, 0.0 }
 0x741   :  { %757 = vadd.xlane.f32.xlu2 %v756_v27 }
 0x7a9   :  { %v755_v32 = vpop.xlane.xlu0 %754 }
 0x7aa   :  { %v759_v33 = vmul.f32 %v755_v32, %v2529_v61 }
 0x7ac   :  { %v761_v34 = vadd.f32 1e-05, %v759_v33 }
 0x7ae   :  { %2084 = vrsqrt.f32 %v761_v34  ;;  %vm769_vm10 = vweird.f32 %v761_v34 }
 0x7b4   :  { %v2085_v39 = vpop.eup %2084  ;;  %v758_v41 = vpop.xlane.xlu2 %757 }
 0x7b5   :  { %v764_v42 = vmul.f32 %v2085_v39, %v761_v34  ;;  %v760_v44 = vmul.f32 %v758_v41, %v2529_v61  ;;  %vm770_vm9 = vweird.f32 %v2085_v39 }
 0x7b6   :  { %vm771_vm11 = vmor %vm769_vm10, %vm770_vm9 }
 0x7b7   :  { %v765_v47 = vmul.f32 %v2085_v39, %v764_v42  ;;  %v762_v60 = vadd.f32 1e-05, %v760_v44  ;;  %v1895_v44 = vld [vmem:[%s2941_s3 + $0x38] sm:$0xff] }
 0x7b8   :  { %965 = vmatpush.msra.mxu3 %v1895_v44 }
 0x7b9   :  { %v766_v45 = vmul.f32 0.5, %v765_v47  ;;  %2086 = vrsqrt.f32 %v762_v60  ;;  %vm779_vm13 = vweird.f32 %v762_v60  ;;  %v1893_v47 = vld [vmem:[%s2941_s3 + $0x28] sm:$0xff] }
 0x7ba   :  { %966 = vmatpush.msra.mxu3 %v1894_v46 }
 0x7bb   :  { %v767_v49 = vsub.f32 1.5, %v766_v45 }
 0x7bc   :  { %967 = vmatpush.msra.mxu3 %v1893_v47 }
 0x7bd   :  { %v768_v51 = vmul.f32 %v2085_v39, %v767_v49 }
 0x7bf   :  { %v2087_v55 = vpop.eup %2086  ;;  %v772_v57 = vsel %vm771_vm11, %v2085_v39, %v768_v51 }
 0x7c0   :  { %v783_v62 = vmul.f32 %v772_v57, %v749_v21  ;;  %v774_v63 = vmul.f32 %v2087_v55, %v762_v60  ;;  %vm780_vm12 = vweird.f32 %v2087_v55  ;;  %v1892_v60 = vld [vmem:[%s2941_s3 + $0x20] sm:$0xff]  ;;  %s2948_s3 = smov 48  }
 0x7c1   :  { %vm781_vm14 = vmor %vm779_vm13, %vm780_vm12  ;;  %968 = vmatpush.msra.mxu3 %v1892_v60 }
 0x7c2   :  { %v788_v2 = vmul.f32 %v2033_v54, %v783_v62  ;;  %v775_v3 = vmul.f32 %v2087_v55, %v774_v63  ;;  %v2037_v63 = vld [vmem:[%s2909_s16] ss:$0 sm:$0xff] }
 0x7c4   :  { %v776_v5 = vmul.f32 0.5, %v775_v3  ;;  %v793_v6 = vadd.f32 %v2034_v0, %v788_v2 }
 0x7c6   :  { %v777_v8 = vsub.f32 1.5, %v776_v5  ;;  %1890 = vmatmul.msk.f32.vlgmr.msra.gmra.mxu0 %vm186_vm5, %v793_v6 }
 0x7c8   :  { %v778_v10 = vmul.f32 %v2087_v55, %v777_v8 }
 0x7ca   :  { %v782_v58 = vsel %vm781_vm14, %v2087_v55, %v778_v10 }
 0x7cb   :  { %v784_v11 = vmul.f32 %v782_v58, %v2534_v25 }
 0x7cd   :  { %v789_v12 = vmul.f32 %v2033_v54, %v784_v11 }
 0x7cf   :  { %v794_v13 = vadd.f32 %v2034_v0, %v789_v12 }
 0x7d1   :  { %1891 = vmatmul.msk.f32.gmra.mxu0 %vm186_vm5, %v794_v13 }
 0x843   :  { %v826_v17 = vpop.f32.mrf.mxu0 }
 0x844   :  { %v827_v18 = vadd.f32 %v2035_v37, %v826_v17 }
 0x846   :  { %v832_v19 = vmax.f32 %v827_v18, 0.0 }
 0x848   :  { %866 = vmatmul.f32.vlgmr.msrb.gmra.mxu2 %v832_v19  ;;  %v1899_v19 = vld [vmem:[%s2901_s8 + $0x20] sm:$0xff] }
 0x849   :  { %1221 = vmatpush.msra.mxu2 %v1899_v19 }
 0x84e   :  { %v829_v20 = vpop.f32.mrf.mxu0 }
 0x84f   :  { %v830_v21 = vadd.f32 %v2035_v37, %v829_v20 }
 0x851   :  { %v833_v22 = vmax.f32 %v830_v21, 0.0 }
 0x853   :  { %869 = vmatmul.f32.gmra.mxu2 %v833_v22 }
 0x8cb   :  { %v867_v23 = vpop.f32.mrf.mxu2 }
 0x8cc   :  { %v873_v24 = vadd.f32 %v867_v23, %v793_v6 }
 0x8ce   :  { %v879_v25 = vadd.f32 %v2036_v40, %v873_v24 }
 0x8d0   :  { %v883_v26 = vsel %vm186_vm5, %v879_v25, 0.0 }
 0x8d1   :  { %884 = vadd.xlane.f32.xlu0 %v883_v26 }
 0x8d6   :  { %v870_v27 = vpop.f32.mrf.mxu2 }
 0x8d7   :  { %v874_v28 = vadd.f32 %v870_v27, %v794_v13 }
 0x8d9   :  { %v880_v29 = vadd.f32 %v2036_v40, %v874_v28 }
 0x8db   :  { %v886_v30 = vsel %vm186_vm5, %v880_v29, 0.0 }
 0x8dc   :  { %887 = vadd.xlane.f32.xlu0 %v886_v30 }
 0x944   :  { %v885_v31 = vpop.xlane.xlu0 %884 }
 0x945   :  { %v889_v32 = vmul.f32 %v885_v31, %v2529_v61 }
 0x947   :  { %v891_v33 = vsub.f32 %v879_v25, %v889_v32 }
 0x949   :  { %v893_v34 = vmul.f32 %v891_v33, %v891_v33 }
 0x94b   :  { %v895_v35 = vsel %vm186_vm5, %v893_v34, 0.0 }
 0x94c   :  { %896 = vadd.xlane.f32.xlu0 %v895_v35 }
 0x94f   :  { %v888_v36 = vpop.xlane.xlu0 %887 }
 0x950   :  { %v890_v38 = vmul.f32 %v888_v36, %v2529_v61 }
 0x952   :  { %v892_v39 = vsub.f32 %v880_v29, %v890_v38 }
 0x954   :  { %v894_v41 = vmul.f32 %v892_v39, %v892_v39 }
 0x956   :  { %v898_v42 = vsel %vm186_vm5, %v894_v41, 0.0 }
 0x957   :  { %899 = vadd.xlane.f32.xlu0 %v898_v42 }
 0x9bf   :  { %v897_v48 = vpop.xlane.xlu0 %896 }
 0x9c0   :  { %v901_v45 = vmul.f32 %v897_v48, %v2529_v61 }
 0x9c2   :  { %v903_v43 = vadd.f32 1e-05, %v901_v45 }
 0x9c4   :  { %2088 = vrsqrt.f32 %v903_v43  ;;  %vm911_vm0 = vweird.f32 %v903_v43 }
 0x9ca   :  { %v2089_v49 = vpop.eup %2088  ;;  %v900_v50 = vpop.xlane.xlu0 %899 }
 0x9cb   :  { %v906_v51 = vmul.f32 %v2089_v49, %v903_v43  ;;  %v902_v53 = vmul.f32 %v900_v50, %v2529_v61  ;;  %vm912_vm15 = vweird.f32 %v2089_v49 }
 0x9cc   :  { %vm913_vm1 = vmor %vm911_vm0, %vm912_vm15 }
 0x9cd   :  { %v907_v54 = vmul.f32 %v2089_v49, %v906_v51  ;;  %v904_v55 = vadd.f32 1e-05, %v902_v53 }
 0x9cf   :  { %v908_v57 = vmul.f32 0.5, %v907_v54  ;;  %2090 = vrsqrt.f32 %v904_v55  ;;  %vm921_vm3 = vweird.f32 %v904_v55 }
 0x9d1   :  { %v909_v59 = vsub.f32 1.5, %v908_v57 }
 0x9d3   :  { %v910_v62 = vmul.f32 %v2089_v49, %v909_v59 }
 0x9d5   :  { %v2091_v0 = vpop.eup %2090  ;;  %v914_v1 = vsel %vm913_vm1, %v2089_v49, %v910_v62 }
 0x9d6   :  { %v925_v2 = vmul.f32 %v914_v1, %v891_v33  ;;  %v916_v3 = vmul.f32 %v2091_v0, %v904_v55  ;;  %vm922_vm2 = vweird.f32 %v2091_v0 }
 0x9d7   :  { %vm923_vm4 = vmor %vm921_vm3, %vm922_vm2 }
 0x9d8   :  { %v930_v5 = vmul.f32 %v2037_v63, %v925_v2  ;;  %v917_v6 = vmul.f32 %v2091_v0, %v916_v3 }
 0x9da   :  { %v918_v7 = vmul.f32 0.5, %v917_v6  ;;  %v2642_v8 = vadd.f32 %v2038_v4, %v930_v5 }
 0x9dc   :  { %v919_v9 = vsub.f32 1.5, %v918_v7  ;;  %1897 = vmatmul.msk.f32.vlgmr.msra.gmra.mxu3 %vm186_vm5, %v2642_v8 }
 0x9de   :  { %v920_v10 = vmul.f32 %v2091_v0, %v919_v9 }
 0x9e0   :  { %v924_v58 = vsel %vm923_vm4, %v2091_v0, %v920_v10 }
 0x9e1   :  { %v926_v11 = vmul.f32 %v924_v58, %v892_v39 }
 0x9e3   :  { %v931_v12 = vmul.f32 %v2037_v63, %v926_v11 }
 0x9e5   :  { %v2646_v13 = vadd.f32 %v2038_v4, %v931_v12 }
 0x9e7   :  { %1898 = vmatmul.msk.f32.gmra.mxu3 %vm186_vm5, %v2646_v13 }
 0xa5f   :  { %v970_v15 = vpop.f32.mrf.mxu3 }
 0xa60   :  { %v971_v16 = vadd.f32 %v2039_v14, %v970_v15 }
 0xa62   :  { %983 = vrot.lane.b32.xlu1 %v971_v16, %s2176_s26 }
 0xa6a   :  { %v973_v37 = vpop.f32.mrf.mxu3 }
 0xa6b   :  { %v974_v17 = vadd.f32 %v2039_v14, %v973_v37 }
 0xa6d   :  { %985 = vrot.lane.b32.xlu0 %v974_v17, %s2176_s26  ;;  %v2655_v18 = vpack.i.bf16 %v971_v16, %v974_v17  ;;  %s2946_s26 = smov 112  }
 0xa75   :  { %2011 = vrot.lane.b32.xlu0 %v2655_v18, %s2177_s4 }
 0xa7d   :  { %1079 = vrot.lane.b32.xlu0 %v971_v16, %s2175_s17 }
 0xa85   :  { %1075 = vrot.lane.b32.xlu0 %v971_v16, %s2174_s25 }
 0xa8d   :  { %1362 = vrot.lane.b32.xlu0 %v974_v17, %s2182_s6 }
 0xa95   :  { %1235 = vrot.lane.b32.xlu0 %v974_v17, %s2179_s23 }
 0xa9d   :  { %1356 = vrot.lane.b32.xlu0 %v971_v16, %s2945_s7 }
 0xaa5   :  { %1358 = vrot.lane.b32.xlu0 %v974_v17, %s2945_s7 }
 0xad4   :  { %v984_v21 = vpop.permute.xlu1 %983 }
 0xadf   :  { %v986_v20 = vpop.permute.xlu0 %985 }
 0xae0   :  { %1903 = vmatpush.xpose.msk.msrb.mxu1 %vm226_vm6, %v986_v20 }
 0xae4   :  { %1904 = vmatpush.xpose.msk.msrb.mxu1 %vm226_vm6, %v984_v21 }
 0xae7   :  { %1905 = vmatmul.msk.f32.vlgmr.msrb.gmra.mxu1 %vm226_vm6, %v971_v16  ;;  %v2012_v22 = vpop.permute.xlu0 %2011 }
 0xae8   :  { %v2013_v40 = vunpack.i.l.bf16 %v2012_v22  ;;  %v2014_v23 = vunpack.i.h.bf16 %v2012_v22 }
 0xaea   :  { %1066 = vmatpush.msrb.mxu0 %v2013_v40 }
 0xaec   :  { %1067 = vmatpush.msrb.mxu0 %v2014_v23 }
 0xaef   :  { %1906 = vmatmul.msk.f32.gmra.mxu1 %vm226_vm6, %v974_v17  ;;  %v1080_v24 = vpop.permute.xlu0 %1079 }
 0xaf7   :  { %v1076_v25 = vpop.permute.xlu0 %1075 }
 0xaff   :  { %v1363_v26 = vpop.permute.xlu0 %1362 }
 0xb00   :  { %1927 = vmatpush.xpose.msk.msrb.mxu2 %vm226_vm6, %v1363_v26 }
 0xb07   :  { %v1236_v49 = vpop.permute.xlu0 %1235 }
 0xb0f   :  { %v1357_v2 = vpop.permute.xlu0 %1356 }
 0xb17   :  { %v1359_v7 = vpop.permute.xlu0 %1358 }
 0xb64   :  { %v1012_v27 = vpop.f32.mrf.mxu1 }
 0xb65   :  { %v1013_v28 = vadd.f32 %v1012_v27, %v2421_v52 }
 0xb67   :  { %v1018_v29 = vsel %vm258_vm7, %v1013_v28, -inf }
 0xb68   :  { %1019 = vmax.xlane.f32.xlu2 %v1018_v29 }
 0xb6c   :  { %v1015_v30 = vpop.f32.mrf.mxu1 }
 0xb6d   :  { %v1016_v31 = vadd.f32 %v1015_v30, %v2428_v56 }
 0xb6f   :  { %v1021_v32 = vsel %vm258_vm7, %v1016_v31, -inf }
 0xb70   :  { %1022 = vmax.xlane.f32.xlu2 %v1021_v32 }
 0xbdb   :  { %v1020_v33 = vpop.xlane.xlu2 %1019 }
 0xbdc   :  { %v1024_v34 = vsub.f32 %v1013_v28, %v1020_v33 }
 0xbde   :  { %v1026_v35 = vmul.f32 1.442695, %v1024_v34 }
 0xbe0   :  { %2092 = vpow2.f32 %v1026_v35 }
 0xbe3   :  { %v1023_v36 = vpop.xlane.xlu2 %1022 }
 0xbe4   :  { %v1025_v38 = vsub.f32 %v1016_v31, %v1023_v36 }
 0xbe6   :  { %v2093_v39 = vpop.eup %2092  ;;  %v1028_v41 = vmul.f32 1.442695, %v1025_v38 }
 0xbe7   :  { %v1030_v42 = vsel %vm258_vm7, %v2093_v39, 0.0 }
 0xbe8   :  { %2094 = vpow2.f32 %v1028_v41  ;;  %1031 = vadd.xlane.f32.xlu2 %v1030_v42 }
 0xbee   :  { %v2095_v44 = vpop.eup %2094 }
 0xbef   :  { %v1033_v46 = vsel %vm258_vm7, %v2095_v44, 0.0 }
 0xbf0   :  { %1034 = vadd.xlane.f32.xlu1 %v1033_v46 }
 0xc00   :  { %1081 = vrot.lane.b32.xlu2 %v974_v17, %s2175_s17 }
 0xc08   :  { %1077 = vrot.lane.b32.xlu2 %v974_v17, %s2174_s25 }
 0xc09   :  { %1233 = vrot.lane.b32.xlu1 %v971_v16, %s2179_s23 }
 0xc10   :  { %1360 = vrot.lane.b32.xlu2 %v971_v16, %s2182_s6  ;;  %s2947_s6 = smov 56  }
 0xc18   :  { %1229 = vrot.lane.b32.xlu2 %v971_v16, %s2946_s26 }
 0xc20   :  { %1231 = vrot.lane.b32.xlu2 %v974_v17, %s2946_s26  ;;  %s2188_s26 = smov 8  }
 0xc5b   :  { %v1032_v47 = vpop.xlane.xlu2 %1031 }
 0xc5c   :  { %2096 = vrcp.f32 %v1032_v47 }
 0xc62   :  { %v2097_v60 = vpop.eup %2096 }
 0xc63   :  { %v1038_v48 = vmul.f32 %v2097_v60, %v2093_v39  ;;  %v1035_v45 = vpop.xlane.xlu1 %1034  ;;  %v1082_v43 = vpop.permute.xlu2 %1081 }
 0xc64   :  { %2098 = vrcp.f32 %v1035_v45  ;;  %1909 = vmatpush.xpose.msk.msrb.mxu3 %vm226_vm6, %v1082_v43 }
 0xc65   :  { %1907 = vmatmul.msk.f32.vlgmr.msrb.gmra.mxu0 %vm258_vm7, %v1038_v48 }
 0xc68   :  { %1910 = vmatpush.xpose.msk.msrb.mxu3 %vm226_vm6, %v1080_v24 }
 0xc6a   :  { %v2099_v50 = vpop.eup %2098 }
 0xc6b   :  { %v1078_v51 = vpop.permute.xlu2 %1077  ;;  %1911 = vmatmul.msk.f32.vlgmr.msrb.gmra.mxu3 %vm226_vm6, %v1076_v25  ;;  %v1039_v53 = vmul.f32 %v2099_v50, %v2095_v44 }
 0xc6c   :  { %1919 = vmatpush.xpose.msk.msra.mxu3 %vm226_vm6, %v1236_v49 }
 0xc6d   :  { %1908 = vmatmul.msk.f32.gmra.mxu0 %vm258_vm7, %v1039_v53 }
 0xc73   :  { %v1361_v54 = vpop.permute.xlu2 %1360  ;;  %1912 = vmatmul.msk.f32.gmra.mxu3 %vm226_vm6, %v1078_v51 }
 0xc74   :  { %1928 = vmatpush.xpose.msk.msrb.mxu2 %vm226_vm6, %v1361_v54 }
 0xc7b   :  { %v1234_v55 = vpop.permute.xlu1 %1233  ;;  %v1230_v57 = vpop.permute.xlu2 %1229 }
 0xc7c   :  { %1920 = vmatpush.xpose.msk.msra.mxu3 %vm226_vm6, %v1234_v55 }
 0xc7f   :  { %1921 = vmatmul.msk.f32.vlgmr.msra.gmra.mxu3 %vm226_vm6, %v1230_v57 }
 0xc83   :  { %v1232_v59 = vpop.permute.xlu2 %1231 }
 0xc87   :  { %1922 = vmatmul.msk.f32.gmra.mxu3 %vm226_vm6, %v1232_v59 }
 0xce2   :  { %v1069_v62 = vpop.f32.mrf.mxu0 }
 0xce3   :  { %1917 = vmatmul.msk.f32.vlgmr.msra.gmra.mxu2 %vm226_vm6, %v1069_v62 }
 0xcea   :  { %v1072_v63 = vpop.f32.mrf.mxu0 }
 0xceb   :  { %1918 = vmatmul.msk.f32.gmra.mxu2 %vm226_vm6, %v1072_v63 }
 0xcee   :  { %v1108_v0 = vpop.f32.mrf.mxu3 }
 0xcef   :  { %v1109_v1 = vadd.f32 %v1108_v0, %v2421_v52  ;;  %v2144_v52 = vld [vmem:[%s2943_s28] sm:$0xff] }
 0xcf1   :  { %v1114_v3 = vsel %vm258_vm7, %v1109_v1, -inf }
 0xcf2   :  { %1115 = vmax.xlane.f32.xlu0 %v1114_v3 }
 0xcf3   :  { %1929 = vmatmul.msk.f32.vlgmr.msrb.gmra.mxu2 %vm226_vm6, %v1357_v2 }
 0xcf6   :  { %v1111_v4 = vpop.f32.mrf.mxu3 }
 0xcf7   :  { %v1112_v5 = vadd.f32 %v1111_v4, %v2428_v56  ;;  %v2145_v56 = vld [vmem:[%s2943_s28 + $0x8] sm:$0xff]  ;;  %s2949_s28 = smov 40  }
 0xcf9   :  { %v1117_v6 = vsel %vm258_vm7, %v1112_v5, -inf }
 0xcfa   :  { %1118 = vmax.xlane.f32.xlu2 %v1117_v6 }
 0xcfb   :  { %1930 = vmatmul.msk.f32.gmra.mxu2 %vm226_vm6, %v1359_v7 }
 0xd02   :  { %v1262_v9 = vpop.f32.mrf.mxu3 }
 0xd03   :  { %v1263_v10 = vadd.f32 %v2144_v52, %v1262_v9 }
 0xd05   :  { %v1268_v58 = vsel %vm258_vm7, %v1263_v10, -inf }
 0xd06   :  { %1269 = vmax.xlane.f32.xlu0 %v1268_v58  ;;  %v1901_v58 = vld [vmem:[%s2901_s8 + $0x30] sm:$0xff] }
 0xd0a   :  { %v1265_v11 = vpop.f32.mrf.mxu3 }
 0xd0b   :  { %v1266_v12 = vadd.f32 %v2145_v56, %v1265_v11 }
 0xd0d   :  { %v1271_v14 = vsel %vm258_vm7, %v1266_v12, -inf }
 0xd0e   :  { %1272 = vmax.xlane.f32.xlu0 %v1271_v14 }
 0xd22   :  { %2016 = vrot.lane.b32.xlu0 %v2655_v18, %s2947_s6 }
 0xd2a   :  { %2026 = vrot.lane.b32.xlu0 %v2655_v18, %s2948_s3 }
 0xd65   :  { %v1116_v19 = vpop.xlane.xlu0 %1115 }
 0xd66   :  { %v2716_v15 = vpop.f32.mrf.mxu2  ;;  %v1120_v22 = vsub.f32 %v1109_v1, %v1116_v19 }
 0xd68   :  { %v1122_v26 = vmul.f32 1.442695, %v1120_v22 }
 0xd6d   :  { %v1119_v16 = vpop.xlane.xlu2 %1118 }
 0xd6e   :  { %v2718_v37 = vpop.f32.mrf.mxu2  ;;  %v1121_v17 = vsub.f32 %v1112_v5, %v1119_v16 }
 0xd70   :  { %v1124_v20 = vmul.f32 1.442695, %v1121_v17 }
 0xd72   :  { %2100 = vpow2.f32 %v1124_v20 }
 0xd73   :  { %2102 = vpow2.f32 %v1122_v26 }
 0xd76   :  { %v1389_v21 = vpop.f32.mrf.mxu2 }
 0xd77   :  { %v1390_v40 = vadd.f32 %v2144_v52, %v1389_v21  ;;  %v1900_v52 = vld [vmem:[%s2901_s8 + $0x28] sm:$0xff] }
 0xd78   :  { %v2101_v28 = vpop.eup %2100  ;;  %1192 = vmatpush.msra.mxu0 %v1900_v52 }
 0xd79   :  { %v1270_v23 = vpop.xlane.xlu0 %1269  ;;  %v1395_v24 = vsel %vm258_vm7, %v1390_v40, -inf  ;;  %v1129_v32 = vsel %vm258_vm7, %v2101_v28, 0.0  ;;  %v2103_v33 = vpop.eup %2102 }
 0xd7a   :  { %v1274_v25 = vsub.f32 %v1263_v10, %v1270_v23  ;;  %1396 = vmax.xlane.f32.xlu1 %v1395_v24  ;;  %v1126_v35 = vsel %vm258_vm7, %v2103_v33, 0.0  ;;  %1346 = vmatpush.msrb.mxu0 %v1901_v58  ;;  %v1956_v58 = vld [vmem:[%s2907_s14 + $0xd8] sm:$0xff] }
 0xd7c   :  { %v1276_v27 = vmul.f32 1.442695, %v1274_v25 }
 0xd7e   :  { %v1392_v29 = vpop.f32.mrf.mxu2  ;;  %2104 = vpow2.f32 %v1276_v27 }
 0xd7f   :  { %v1393_v30 = vadd.f32 %v2145_v56, %v1392_v29 }
 0xd81   :  { %v1398_v31 = vsel %vm258_vm7, %v1393_v30, -inf  ;;  %v1273_v38 = vpop.xlane.xlu0 %1272 }
 0xd82   :  { %1399 = vmax.xlane.f32.xlu2 %v1398_v31  ;;  %1130 = vadd.xlane.f32.xlu1 %v1129_v32  ;;  %v1275_v51 = vsub.f32 %v1266_v12, %v1273_v38 }
 0xd84   :  { %v2105_v34 = vpop.eup %2104  ;;  %v1278_v55 = vmul.f32 1.442695, %v1275_v51 }
 0xd85   :  { %v1280_v36 = vsel %vm258_vm7, %v2105_v34, 0.0 }
 0xd8a   :  { %1127 = vadd.xlane.f32.xlu2 %v1126_v35  ;;  %1281 = vadd.xlane.f32.xlu1 %v1280_v36 }
 0xd94   :  { %v2017_v39 = vpop.permute.xlu0 %2016 }
 0xd95   :  { %v2018_v41 = vunpack.i.l.bf16 %v2017_v39  ;;  %v2019_v42 = vunpack.i.h.bf16 %v2017_v39 }
 0xd97   :  { %1162 = vmatpush.msra.mxu1 %v2018_v41 }
 0xd99   :  { %1163 = vmatpush.msra.mxu1 %v2019_v42 }
 0xd9c   :  { %v2027_v44 = vpop.permute.xlu0 %2026 }
 0xd9d   :  { %v2028_v46 = vunpack.i.l.bf16 %v2027_v44  ;;  %v2029_v47 = vunpack.i.h.bf16 %v2027_v44 }
 0xd9f   :  { %1316 = vmatpush.msrb.mxu1 %v2028_v46 }
 0xda1   :  { %1317 = vmatpush.msrb.mxu1 %v2029_v47 }
 0xded   :  { %v1397_v60 = vpop.xlane.xlu1 %1396 }
 0xdee   :  { %v1401_v48 = vsub.f32 %v1390_v40, %v1397_v60 }
 0xdf0   :  { %v1403_v45 = vmul.f32 1.442695, %v1401_v48 }
 0xdf2   :  { %2106 = vpow2.f32 %v1403_v45 }
 0xdf5   :  { %v1400_v43 = vpop.xlane.xlu2 %1399  ;;  %v1131_v59 = vpop.xlane.xlu1 %1130 }
 0xdf6   :  { %v1402_v49 = vsub.f32 %v1393_v30, %v1400_v43 }
 0xdf8   :  { %v2107_v50 = vpop.eup %2106  ;;  %v1405_v53 = vmul.f32 1.442695, %v1402_v49 }
 0xdf9   :  { %v1407_v54 = vsel %vm258_vm7, %v2107_v50, 0.0 }
 0xdfa   :  { %2108 = vpow2.f32 %v1405_v53  ;;  %1408 = vadd.xlane.f32.xlu2 %v1407_v54 }
 0xdfd   :  { %v1128_v57 = vpop.xlane.xlu2 %1127  ;;  %v1282_v3 = vpop.xlane.xlu1 %1281 }
 0xdfe   :  { %2110 = vrcp.f32 %v1128_v57  ;;  %v1941_v57 = vld [vmem:[%s2905_s12 + $0x38] sm:$0xff] }
 0xdff   :  { %2112 = vpow2.f32 %v1278_v55 }
 0xe00   :  { %v2109_v62 = vpop.eup %2108  ;;  %2114 = vrcp.f32 %v1131_v59  ;;  %v1940_v59 = vld [vmem:[%s2905_s12 + $0x30] sm:$0xff] }
 0xe01   :  { %v1410_v63 = vsel %vm258_vm7, %v2109_v62, 0.0  ;;  %2116 = vrcp.f32 %v1282_v3  ;;  %v1960_v3 = vld [vmem:[%s2907_s14 + $0xf8] sm:$0xff] }
 0xe02   :  { %1411 = vadd.xlane.f32.xlu1 %v1410_v63  ;;  %v1938_v63 = vld [vmem:[%s2905_s12 + $0x20] sm:$0xff]  ;;  %1608 = vmatpush.msra.mxu2 %v1960_v3 }
 0xe04   :  { %v2111_v0 = vpop.eup %2110 }
 0xe05   :  { %v1134_v1 = vmul.f32 %v2111_v0, %v2103_v33  ;;  %v2113_v2 = vpop.eup %2112 }
 0xe06   :  { %v1283_v4 = vsel %vm258_vm7, %v2113_v2, 0.0  ;;  %v2115_v5 = vpop.eup %2114 }
 0xe07   :  { %1913 = vmatmul.msk.f32.vlgmr.msra.gmra.mxu1 %vm258_vm7, %v1134_v1  ;;  %v1135_v6 = vmul.f32 %v2115_v5, %v2101_v28  ;;  %v2117_v7 = vpop.eup %2116  ;;  %v1958_v5 = vld [vmem:[%s2907_s14 + $0xe8] sm:$0xff] }
 0xe08   :  { %v1288_v9 = vmul.f32 %v2117_v7, %v2105_v34  ;;  %v2040_v34 = vld [vmem:[%s2902_s9 + $0x1] ss:$0 sm:$0xff]  ;;  %s1837_s9 = sshll.u32 %s2915_s22, 4  ;;  %s1838_s9 = int_to_ptr.hbm [resolvable:$true] %s1837_s9 }
 0xe0a   :  { %1284 = vadd.xlane.f32.xlu1 %v1283_v4  ;;  %v1959_v4 = vld [vmem:[%s2907_s14 + $0xf0] sm:$0xff] }
 0xe0b   :  { %1609 = vmatpush.msra.mxu2 %v1959_v4 }
 0xe0d   :  { %1610 = vmatpush.msra.mxu2 %v1958_v5 }
 0xe0f   :  { %1914 = vmatmul.msk.f32.gmra.mxu1 %vm258_vm7, %v1135_v6 }
 0xe12   :  { %2021 = vrot.lane.b32.xlu2 %v2655_v18, %s2949_s28  ;;  %v1902_v18 = vld [vmem:[%s2901_s8 + $0x38] sm:$0xff] }
 0xe13   :  { %1473 = vmatpush.msra.mxu1 %v1902_v18 }
 0xe17   :  { %1923 = vmatmul.msk.f32.vlgmr.msrb.gmra.mxu1 %vm258_vm7, %v1288_v9  ;;  %v1957_v9 = vld [vmem:[%s2907_s14 + $0xe0] sm:$0xff] }
 0xe18   :  { %1611 = vmatpush.msra.mxu2 %v1957_v9 }
 0xe1a   :  { %1612 = vmatpush.msra.mxu2 %v1956_v58 }
 0xe6d   :  { %v1409_v10 = vpop.xlane.xlu2 %1408 }
 0xe6e   :  { %2118 = vrcp.f32 %v1409_v10 }
 0xe74   :  { %v2119_v12 = vpop.eup %2118 }
 0xe75   :  { %v2022_v11 = vpop.permute.xlu2 %2021  ;;  %v1412_v56 = vpop.xlane.xlu1 %1411  ;;  %v1415_v17 = vmul.f32 %v2119_v12, %v2107_v50  ;;  %v1954_v12 = vld [vmem:[%s2907_s14 + $0xc8] sm:$0xff] }
 0xe76   :  { %v2023_v14 = vunpack.i.l.bf16 %v2022_v11  ;;  %v2024_v16 = vunpack.i.h.bf16 %v2022_v11  ;;  %2120 = vrcp.f32 %v1412_v56  ;;  %v1955_v56 = vld [vmem:[%s2907_s14 + $0xd0] sm:$0xff] }
 0xe77   :  { %1613 = vmatpush.msra.mxu2 %v1955_v56 }
 0xe78   :  { %1443 = vmatpush.msrb.mxu3 %v2023_v14 }
 0xe79   :  { %1614 = vmatpush.msra.mxu2 %v1954_v12 }
 0xe7a   :  { %1444 = vmatpush.msrb.mxu3 %v2024_v16  ;;  %v1953_v16 = vld [vmem:[%s2907_s14 + $0xc0] sm:$0xff] }
 0xe7b   :  { %1931 = vmatmul.msk.f32.vlgmr.msrb.gmra.mxu3 %vm258_vm7, %v1415_v17  ;;  %1615 = vmatpush.msra.mxu2 %v1953_v16 }
 0xe7c   :  { %v2121_v20 = vpop.eup %2120 }
 0xe7d   :  { %v1285_v19 = vpop.xlane.xlu1 %1284  ;;  %v1416_v21 = vmul.f32 %v2121_v20, %v2109_v62  ;;  %v1939_v62 = vld [vmem:[%s2905_s12 + $0x28] sm:$0xff]  ;;  %v1952_v20 = vld [vmem:[%s2907_s14 + $0xb8] sm:$0xff] }
 0xe7e   :  { %2122 = vrcp.f32 %v1285_v19  ;;  %1616 = vmatpush.msra.mxu2 %v1952_v20 }
 0xe83   :  { %1932 = vmatmul.msk.f32.gmra.mxu3 %vm258_vm7, %v1416_v21 }
 0xe84   :  { %v2123_v22 = vpop.eup %2122  ;;  %v1165_v40 = vpop.f32.mrf.mxu1 }
 0xe85   :  { %1915 = vmatmul.msk.f32.vlgmr.msra.gmra.mxu0 %vm226_vm6, %v1165_v40  ;;  %v1289_v23 = vmul.f32 %v2123_v22, %v2113_v2  ;;  %v2041_v40 = vld [vmem:[%s2903_s10 + $0x1] ss:$0 sm:$0xff] }
 0xe86   :  { %1578 = vmatpush.msra.mxu0 %v1941_v57 }
 0xe87   :  { %1924 = vmatmul.msk.f32.gmra.mxu1 %vm258_vm7, %v1289_v23  ;;  %v1951_v23 = vld [vmem:[%s2907_s14 + $0xb0] sm:$0xff] }
 0xe88   :  { %1579 = vmatpush.msra.mxu0 %v1940_v59  ;;  %1617 = vmatpush.msra.mxu2 %v1951_v23 }
 0xe8a   :  { %1580 = vmatpush.msra.mxu0 %v1939_v62 }
 0xe8c   :  { %v1168_v24 = vpop.f32.mrf.mxu1  ;;  %1581 = vmatpush.msra.mxu0 %v1938_v63 }
 0xe8d   :  { %1916 = vmatmul.msk.f32.gmra.mxu0 %vm226_vm6, %v1168_v24 }
 0xe94   :  { %v1319_v25 = vpop.f32.mrf.mxu1 }
 0xe95   :  { %1925 = vmatmul.msk.f32.vlgmr.msrb.gmra.mxu0 %vm226_vm6, %v1319_v25 }
 0xefe   :  { %v1446_v26 = vpop.f32.mrf.mxu3 }
 0xeff   :  { %1933 = vmatmul.msk.f32.vlgmr.msra.gmra.mxu1 %vm226_vm6, %v1446_v26 }
 0xf02   :  { %v1194_v29 = vpop.f32.mrf.mxu0 }
 0xf03   :  { %v1224_v32 = vadd.f32 %v2716_v15, %v1194_v29 }
 0xf04   :  { %v1322_v27 = vpop.f32.mrf.mxu1 }
 0xf05   :  { %1926 = vmatmul.msk.f32.gmra.mxu0 %vm226_vm6, %v1322_v27  ;;  %v2042_v27 = vld [vmem:[%s2904_s11 + $0x1] ss:$0 sm:$0xff] }
 0xf06   :  { %v1449_v28 = vpop.f32.mrf.mxu3 }
 0xf07   :  { %1934 = vmatmul.msk.f32.gmra.mxu1 %vm226_vm6, %v1449_v28  ;;  %v1950_v28 = vld [vmem:[%s2907_s14 + $0xa8] sm:$0xff] }
 0xf08   :  { %1618 = vmatpush.msra.mxu2 %v1950_v28 }
 0xf0a   :  { %v1197_v30 = vpop.f32.mrf.mxu0 }
 0xf0b   :  { %v1227_v39 = vadd.f32 %v2718_v37, %v1197_v30 }
 0xf12   :  { %v1348_v31 = vpop.f32.mrf.mxu0 }
 0xf13   :  { %v1354_v33 = vadd.f32 %v1348_v31, %v1224_v32  ;;  %v1949_v31 = vld [vmem:[%s2907_s14 + $0xa0] sm:$0xff] }
 0xf14   :  { %1619 = vmatpush.msra.mxu2 %v1949_v31 }
 0xf7c   :  { %v1475_v35 = vpop.f32.mrf.mxu1 }
 0xf7d   :  { %v1481_v36 = vadd.f32 %v1475_v35, %v1354_v33 }
 0xf7f   :  { %v1488_v38 = vadd.f32 %v2040_v34, %v1481_v36 }
 0xf81   :  { %v1490_v41 = vadd.f32 %v1488_v38, %v2642_v8 }
 0xf82   :  { %v1351_v42 = vpop.f32.mrf.mxu0 }
 0xf83   :  { %v1355_v44 = vadd.f32 %v1351_v42, %v1227_v39  ;;  %v1496_v46 = vsel %vm186_vm5, %v1490_v41, 0.0  ;;  %v1947_v42 = vld [vmem:[%s2907_s14 + $0x90] sm:$0xff] }
 0xf84   :  { %1497 = vadd.xlane.f32.xlu0 %v1496_v46  ;;  %v1478_v47 = vpop.f32.mrf.mxu1  ;;  %v1945_v46 = vld [vmem:[%s2907_s14 + $0x80] sm:$0xff] }
 0xf85   :  { %v1482_v60 = vadd.f32 %v1478_v47, %v1355_v44  ;;  %v1946_v44 = vld [vmem:[%s2907_s14 + $0x88] sm:$0xff]  ;;  %v2043_v47 = vld [vmem:[%s2906_s13 + $0x1] ss:$0 sm:$0xff] }
 0xf87   :  { %v1489_v15 = vadd.f32 %v2040_v34, %v1482_v60  ;;  %v1948_v34 = vld [vmem:[%s2907_s14 + $0x98] sm:$0xff] }
 0xf88   :  { %1620 = vmatpush.msra.mxu2 %v1948_v34 }
 0xf89   :  { %v1491_v48 = vadd.f32 %v1489_v15, %v2646_v13 }
 0xf8a   :  { %1621 = vmatpush.msra.mxu2 %v1947_v42 }
 0xf8b   :  { %v1499_v45 = vsel %vm186_vm5, %v1491_v48, 0.0 }
 0xf8c   :  { %1500 = vadd.xlane.f32.xlu1 %v1499_v45  ;;  %1622 = vmatpush.msra.mxu2 %v1946_v44 }
 0xf8e   :  { %1623 = vmatpush.msra.mxu2 %v1945_v46 }
 0xff7   :  { %v1498_v43 = vpop.xlane.xlu0 %1497 }
 0xff8   :  { %v1502_v49 = vmul.f32 %v1498_v43, %v2529_v61 }
 0xffa   :  { %v1504_v50 = vsub.f32 %v1490_v41, %v1502_v49 }
 0xffc   :  { %v1506_v37 = vmul.f32 %v1504_v50, %v1504_v50 }
 0xffe   :  { %v1508_v8 = vsel %vm186_vm5, %v1506_v37, 0.0 }
 0xfff   :  { %1509 = vadd.xlane.f32.xlu2 %v1508_v8  ;;  %v1501_v51 = vpop.xlane.xlu1 %1500 }
0x1000   :  { %v1503_v53 = vmul.f32 %v1501_v51, %v2529_v61 }
0x1002   :  { %v2763_v54 = vsub.f32 %v1491_v48, %v1503_v53 }
0x1004   :  { %v1507_v55 = vmul.f32 %v2763_v54, %v2763_v54 }
0x1006   :  { %v1511_v13 = vsel %vm186_vm5, %v1507_v55, 0.0 }
0x1007   :  { %1512 = vadd.xlane.f32.xlu1 %v1511_v13 }
0x1072   :  { %v1510_v0 = vpop.xlane.xlu2 %1509 }
0x1073   :  { %v1514_v1 = vmul.f32 %v1510_v0, %v2529_v61 }
0x1075   :  { %v1516_v2 = vadd.f32 1e-05, %v1514_v1 }
0x1077   :  { %2124 = vrsqrt.f32 %v1516_v2  ;;  %vm1524_vm7 = vweird.f32 %v1516_v2 }
0x107a   :  { %v1513_v6 = vpop.xlane.xlu1 %1512 }
0x107b   :  { %v1515_v7 = vmul.f32 %v1513_v6, %v2529_v61 }
0x107d   :  { %v2125_v52 = vpop.eup %2124  ;;  %v1517_v10 = vadd.f32 1e-05, %v1515_v7 }
0x107e   :  { %v1519_v11 = vmul.f32 %v2125_v52, %v1516_v2  ;;  %vm1525_vm6 = vweird.f32 %v2125_v52 }
0x107f   :  { %2126 = vrsqrt.f32 %v1517_v10  ;;  %vm1526_vm8 = vmor %vm1524_vm7, %vm1525_vm6  ;;  %vm1534_vm10 = vweird.f32 %v1517_v10 }
0x1080   :  { %v1520_v18 = vmul.f32 %v2125_v52, %v1519_v11 }
0x1082   :  { %v1521_v14 = vmul.f32 0.5, %v1520_v18 }
0x1084   :  { %v1522_v17 = vsub.f32 1.5, %v1521_v14 }
0x1085   :  { %v2127_v19 = vpop.eup %2126 }
0x1086   :  { %v1523_v21 = vmul.f32 %v2125_v52, %v1522_v17  ;;  %v1529_v22 = vmul.f32 %v2127_v19, %v1517_v10  ;;  %vm1535_vm9 = vweird.f32 %v2127_v19 }
0x1087   :  { %vm1536_vm11 = vmor %vm1534_vm10, %vm1535_vm9 }
0x1088   :  { %v1527_v24 = vsel %vm1526_vm8, %v2125_v52, %v1523_v21  ;;  %v1530_v25 = vmul.f32 %v2127_v19, %v1529_v22  ;;  %v2045_v21 = vld [vmem:[%s2909_s16 + $0x1] ss:$0 sm:$0xff] }
0x1089   :  { %v1538_v26 = vmul.f32 %v1527_v24, %v1504_v50  ;;  %v2044_v50 = vld [vmem:[%s2908_s15 + $0x1] ss:$0 sm:$0xff] }
0x108a   :  { %v1531_v29 = vmul.f32 0.5, %v1530_v25  ;;  %v2046_v24 = vld [vmem:[%s2944_s27 + $0x1] ss:$0 sm:$0xff] }
0x108b   :  { %v1543_v30 = vmul.f32 %v2041_v40, %v1538_v26 }
0x108c   :  { %v1532_v32 = vsub.f32 1.5, %v1531_v29 }
0x108d   :  { %v1548_v33 = vadd.f32 %v2042_v27, %v1543_v30 }
0x108e   :  { %v1533_v35 = vmul.f32 %v2127_v19, %v1532_v32 }
0x108f   :  { %1943 = vmatmul.msk.f32.vlgmr.msra.gmra.mxu0 %vm186_vm5, %v1548_v33 }
0x1090   :  { %v1537_v36 = vsel %vm1536_vm11, %v2127_v19, %v1533_v35 }
0x1091   :  { %v1539_v38 = vmul.f32 %v1537_v36, %v2763_v54 }
0x1093   :  { %v1544_v39 = vmul.f32 %v2041_v40, %v1539_v38 }
0x1095   :  { %v1549_v41 = vadd.f32 %v2042_v27, %v1544_v39 }
0x1097   :  { %1944 = vmatmul.msk.f32.gmra.mxu0 %vm186_vm5, %v1549_v41 }
0x110c   :  { %v1583_v60 = vpop.f32.mrf.mxu0 }
0x110d   :  { %v1584_v15 = vadd.f32 %v2043_v47, %v1583_v60 }
0x110f   :  { %v1589_v48 = vmax.f32 %v1584_v15, 0.0 }
0x1111   :  { %1624 = vmatmul.f32.vlgmr.msra.gmra.mxu2 %v1589_v48  ;;  %v1757_v48 = vld [vmem:[%s2913_s20 + $0x18] sm:$0xff] }
0x1112   :  { %1780 = vmatpush.msra.mxu3 %v1757_v48 }
0x1114   :  { %v1586_v45 = vpop.f32.mrf.mxu0 }
0x1115   :  { %v1587_v43 = vadd.f32 %v2043_v47, %v1586_v45  ;;  %v1756_v45 = vld [vmem:[%s2913_s20 + $0x10] sm:$0xff] }
0x1116   :  { %1781 = vmatpush.msra.mxu3 %v1756_v45 }
0x1117   :  { %v1590_v49 = vmax.f32 %v1587_v43, 0.0  ;;  %v1755_v43 = vld [vmem:[%s2913_s20 + $0x8] sm:$0xff] }
0x1118   :  { %1782 = vmatpush.msra.mxu3 %v1755_v43 }
0x1119   :  { %1627 = vmatmul.f32.gmra.mxu2 %v1590_v49  ;;  %v1754_v49 = vld [vmem:[%s2913_s20] sm:$0xff] }
0x111a   :  { %1783 = vmatpush.msra.mxu3 %v1754_v49 }
0x1194   :  { %v1625_v37 = vpop.f32.mrf.mxu2 }
0x1195   :  { %v1631_v8 = vadd.f32 %v1625_v37, %v1548_v33 }
0x1197   :  { %v1638_v51 = vadd.f32 %v2044_v50, %v1631_v8 }
0x1199   :  { %v1644_v53 = vsel %vm186_vm5, %v1638_v51, 0.0 }
0x119a   :  { %1645 = vadd.xlane.f32.xlu1 %v1644_v53 }
0x119c   :  { %v1628_v54 = vpop.f32.mrf.mxu2 }
0x119d   :  { %v1632_v55 = vadd.f32 %v1628_v54, %v1549_v41 }
0x119f   :  { %v1639_v13 = vadd.f32 %v2044_v50, %v1632_v55 }
0x11a1   :  { %v1647_v57 = vsel %vm186_vm5, %v1639_v13, 0.0 }
0x11a2   :  { %1648 = vadd.xlane.f32.xlu1 %v1647_v57 }
0x120d   :  { %v1646_v59 = vpop.xlane.xlu1 %1645 }
0x120e   :  { %v1650_v62 = vmul.f32 %v1646_v59, %v2529_v61 }
0x1210   :  { %v1652_v63 = vsub.f32 %v1638_v51, %v1650_v62 }
0x1212   :  { %v1654_v0 = vmul.f32 %v1652_v63, %v1652_v63 }
0x1214   :  { %v1656_v1 = vsel %vm186_vm5, %v1654_v0, 0.0 }
0x1215   :  { %1657 = vadd.xlane.f32.xlu1 %v1656_v1  ;;  %v1649_v2 = vpop.xlane.xlu1 %1648 }
0x1216   :  { %v1651_v3 = vmul.f32 %v1649_v2, %v2529_v61  ;;  %v2047_v2 = vld [vmem:[%s2911_s18] ss:$0 sm:$0xff] }
0x1218   :  { %v1653_v4 = vsub.f32 %v1639_v13, %v1651_v3 }
0x121a   :  { %v1655_v5 = vmul.f32 %v1653_v4, %v1653_v4 }
0x121c   :  { %v1659_v6 = vsel %vm186_vm5, %v1655_v5, 0.0  ;;  %v2048_v5 = vld [vmem:[%s2912_s19] ss:$0 sm:$0xff]  ;;  %s2186_s19 = smov [#allocation2]  }
0x121d   :  { %1660 = vadd.xlane.f32.xlu0 %v1659_v6 }
0x1288   :  { %v1658_v7 = vpop.xlane.xlu1 %1657 }
0x1289   :  { %v1662_v9 = vmul.f32 %v1658_v7, %v2529_v61 }
0x128b   :  { %v1664_v52 = vadd.f32 1e-05, %v1662_v9 }
0x128d   :  { %2128 = vrsqrt.f32 %v1664_v52  ;;  %vm1672_vm13 = vweird.f32 %v1664_v52 }
0x1290   :  { %v1661_v10 = vpop.xlane.xlu0 %1660 }
0x1291   :  { %v1663_v58 = vmul.f32 %v1661_v10, %v2529_v61 }
0x1293   :  { %v2129_v11 = vpop.eup %2128  ;;  %v1665_v56 = vadd.f32 1e-05, %v1663_v58 }
0x1294   :  { %v1667_v18 = vmul.f32 %v2129_v11, %v1664_v52  ;;  %vm1673_vm12 = vweird.f32 %v2129_v11 }
0x1295   :  { %2130 = vrsqrt.f32 %v1665_v56  ;;  %vm1674_vm14 = vmor %vm1672_vm13, %vm1673_vm12  ;;  %vm1682_vm0 = vweird.f32 %v1665_v56 }
0x1296   :  { %v1668_v12 = vmul.f32 %v2129_v11, %v1667_v18 }
0x1298   :  { %v1669_v14 = vmul.f32 0.5, %v1668_v12  ;;  %v2049_v12 = vld [vmem:[%s2914_s21] ss:$0 sm:$0xff]  ;;  %s1835_s21 = sshll.u32 %s2186_s19, 4  ;;  %s1836_s21 = int_to_ptr.vmem [resolvable:$true] %s1835_s21 }
0x129a   :  { %v1670_v16 = vsub.f32 1.5, %v1669_v14 }
0x129b   :  { %v2131_v17 = vpop.eup %2130 }
0x129c   :  { %v1671_v19 = vmul.f32 %v2129_v11, %v1670_v16  ;;  %v1677_v20 = vmul.f32 %v2131_v17, %v1665_v56  ;;  %vm1683_vm15 = vweird.f32 %v2131_v17 }
0x129d   :  { %vm1684_vm1 = vmor %vm1682_vm0, %vm1683_vm15 }
0x129e   :  { %v1678_v22 = vmul.f32 %v2131_v17, %v1677_v20  ;;  %v1675_v40 = vsel %vm1674_vm14, %v2129_v11, %v1671_v19 }
0x129f   :  { %v1686_v23 = vmul.f32 %v1675_v40, %v1652_v63 }
0x12a0   :  { %v1679_v25 = vmul.f32 0.5, %v1678_v22 }
0x12a1   :  { %v1691_v26 = vmul.f32 %v2045_v21, %v1686_v23 }
0x12a2   :  { %v1680_v27 = vsub.f32 1.5, %v1679_v25 }
0x12a3   :  { %v1696_v28 = vadd.f32 %v2046_v24, %v1691_v26 }
0x12a4   :  { %v1681_v29 = vmul.f32 %v2131_v17, %v1680_v27 }
0x12a5   :  { %v1700_v30 = vsel %vm186_vm5, %v1696_v28, 0.0 }
0x12a6   :  { %1701 = vadd.xlane.f32.xlu1 %v1700_v30  ;;  %v1685_v31 = vsel %vm1684_vm1, %v2131_v17, %v1681_v29 }
0x12a7   :  { %v1687_v32 = vmul.f32 %v1685_v31, %v1653_v4 }
0x12a9   :  { %v1692_v33 = vmul.f32 %v2045_v21, %v1687_v32 }
0x12ab   :  { %v1697_v34 = vadd.f32 %v2046_v24, %v1692_v33 }
0x12ad   :  { %v1703_v35 = vsel %vm186_vm5, %v1697_v34, 0.0 }
0x12ae   :  { %1704 = vadd.xlane.f32.xlu0 %v1703_v35 }
0x1319   :  { %v1702_v36 = vpop.xlane.xlu1 %1701 }
0x131a   :  { %v1706_v38 = vmul.f32 %v1702_v36, %v2529_v61 }
0x131c   :  { %v1708_v39 = vsub.f32 %v1696_v28, %v1706_v38 }
0x131e   :  { %v1710_v41 = vmul.f32 %v1708_v39, %v1708_v39 }
0x1320   :  { %v1712_v42 = vsel %vm186_vm5, %v1710_v41, 0.0 }
0x1321   :  { %v1705_v44 = vpop.xlane.xlu0 %1704  ;;  %1713 = vadd.xlane.f32.xlu2 %v1712_v42 }
0x1322   :  { %v1707_v46 = vmul.f32 %v1705_v44, %v2529_v61 }
0x1324   :  { %v1709_v47 = vsub.f32 %v1697_v34, %v1707_v46 }
0x1326   :  { %v1711_v60 = vmul.f32 %v1709_v47, %v1709_v47 }
0x1328   :  { %v1715_v15 = vsel %vm186_vm5, %v1711_v60, 0.0 }
0x1329   :  { %1716 = vadd.xlane.f32.xlu1 %v1715_v15 }
0x1394   :  { %v1714_v50 = vpop.xlane.xlu2 %1713 }
0x1395   :  { %v1718_v37 = vmul.f32 %v1714_v50, %v2529_v61 }
0x1397   :  { %v1720_v8 = vadd.f32 1e-05, %v1718_v37 }
0x1399   :  { %2132 = vrsqrt.f32 %v1720_v8  ;;  %vm1728_vm3 = vweird.f32 %v1720_v8 }
0x139c   :  { %v1717_v51 = vpop.xlane.xlu1 %1716 }
0x139d   :  { %v1719_v53 = vmul.f32 %v1717_v51, %v2529_v61 }
0x139f   :  { %v2133_v54 = vpop.eup %2132  ;;  %v1721_v55 = vadd.f32 1e-05, %v1719_v53 }
0x13a0   :  { %v1723_v13 = vmul.f32 %v2133_v54, %v1720_v8  ;;  %vm1729_vm2 = vweird.f32 %v2133_v54 }
0x13a1   :  { %2134 = vrsqrt.f32 %v1721_v55  ;;  %vm1730_vm4 = vmor %vm1728_vm3, %vm1729_vm2  ;;  %vm1738_vm7 = vweird.f32 %v1721_v55 }
0x13a2   :  { %v1724_v57 = vmul.f32 %v2133_v54, %v1723_v13 }
0x13a4   :  { %v1725_v59 = vmul.f32 0.5, %v1724_v57 }
0x13a6   :  { %v1726_v62 = vsub.f32 1.5, %v1725_v59 }
0x13a7   :  { %v2135_v63 = vpop.eup %2134 }
0x13a8   :  { %v1727_v0 = vmul.f32 %v2133_v54, %v1726_v62  ;;  %v1733_v1 = vmul.f32 %v2135_v63, %v1721_v55  ;;  %vm1739_vm6 = vweird.f32 %v2135_v63 }
0x13a9   :  { %vm1740_vm8 = vmor %vm1738_vm7, %vm1739_vm6 }
0x13aa   :  { %v1731_v3 = vsel %vm1730_vm4, %v2133_v54, %v1727_v0  ;;  %v1734_v4 = vmul.f32 %v2135_v63, %v1733_v1 }
0x13ab   :  { %v1742_v61 = vmul.f32 %v1731_v3, %v1708_v39 }
0x13ac   :  { %v1735_v6 = vmul.f32 0.5, %v1734_v4 }
0x13ad   :  { %v1747_v7 = vmul.f32 %v2047_v2, %v1742_v61 }
0x13ae   :  { %v1736_v9 = vsub.f32 1.5, %v1735_v6 }
0x13af   :  { %v1752_v52 = vadd.f32 %v2048_v5, %v1747_v7 }
0x13b0   :  { %v1737_v10 = vmul.f32 %v2135_v63, %v1736_v9 }
0x13b1   :  { %1964 = vmatmul.msk.f32.vlgmr.msra.gmra.mxu3 %vm186_vm5, %v1752_v52 }
0x13b2   :  { %v1741_v58 = vsel %vm1740_vm8, %v2135_v63, %v1737_v10 }
0x13b3   :  { %v1743_v11 = vmul.f32 %v1741_v58, %v1709_v47 }
0x13b5   :  { %v1748_v56 = vmul.f32 %v2047_v2, %v1743_v11 }
0x13b7   :  { %v1753_v18 = vadd.f32 %v2048_v5, %v1748_v56 }
0x13b9   :  { %1965 = vmatmul.msk.f32.gmra.mxu3 %vm186_vm5, %v1753_v18 }
0x1434   :  { %v1785_v14 = vpop.f32.mrf.mxu3 }
0x1435   :  { %v1786_v16 = vadd.f32 %v2049_v12, %v1785_v14 }
0x1437   :  { %v1966_v17 = vmul.f32 -1.442695, %v1786_v16 }
0x1439   :  { %2136 = vpow2.f32 %v1966_v17 }
0x143c   :  { %v1788_v19 = vpop.f32.mrf.mxu3 }
0x143d   :  { %v1789_v20 = vadd.f32 %v2049_v12, %v1788_v19 }
0x143f   :  { %v2137_v21 = vpop.eup %2136  ;;  %v1967_v22 = vmul.f32 -1.442695, %v1789_v20 }
0x1440   :  { %v1797_v40 = vadd.f32 1.0, %v2137_v21 }
0x1441   :  { %2138 = vpow2.f32 %v1967_v22 }
0x1442   :  { %2140 = vrcp.f32 %v1797_v40  ;;  %v1810_v28 = vand.u32 2147483648, %v1797_v40  ;;  %v1808_v30 = vand.u32 2147483647, %v1797_v40  ;;  %vm1804_vm9 = vweird.f32 %v1797_v40 }
0x1444   :  { %v1811_v33 = vor.u32 1.1754944e-38, %v1810_v28  ;;  %vm1809_vm11 = vcmp.eq.f32.partialorder %v1808_v30, 8.507059e+37 }
0x1447   :  { %v2139_v23 = vpop.eup %2138 }
0x1448   :  { %v2141_v24 = vpop.eup %2140  ;;  %v1798_v25 = vadd.f32 1.0, %v2139_v23 }
0x1449   :  { %v1800_v26 = vmul.f32 %v2141_v24, %v1797_v40  ;;  %vm1805_vm5 = vweird.f32 %v2141_v24 }
0x144a   :  { %2142 = vrcp.f32 %v1798_v25  ;;  %vm1806_vm10 = vmor %vm1804_vm9, %vm1805_vm5  ;;  %v1825_v39 = vand.u32 2147483648, %v1798_v25  ;;  %v1823_v42 = vand.u32 2147483647, %v1798_v25  ;;  %vm1819_vm13 = vweird.f32 %v1798_v25 }
0x144b   :  { %v1801_v27 = vsub.f32 1.0, %v1800_v26 }
0x144c   :  { %v1826_v46 = vor.u32 1.1754944e-38, %v1825_v39  ;;  %vm1824_vm15 = vcmp.eq.f32.partialorder %v1823_v42, 8.507059e+37 }
0x144d   :  { %v1802_v29 = vmul.f32 %v2141_v24, %v1801_v27 }
0x144f   :  { %v1803_v31 = vadd.f32 %v2141_v24, %v1802_v29 }
0x1450   :  { %v2143_v32 = vpop.eup %2142 }
0x1451   :  { %v1815_v34 = vmul.f32 %v2143_v32, %v1798_v25  ;;  %v1807_v35 = vsel %vm1806_vm10, %v2141_v24, %v1803_v31  ;;  %vm1820_vm12 = vweird.f32 %v2143_v32 }
0x1452   :  { %v1812_v36 = vsel %vm1809_vm11, %v1811_v33, %v1807_v35  ;;  %vm1821_vm14 = vmor %vm1819_vm13, %vm1820_vm12 }
0x1453   :  { %v1816_v38 = vsub.f32 1.0, %v1815_v34  ;;  %1829 = vst [vmem:[#allocation2] sm:$0xff] %v1812_v36 }
0x1455   :  { %v1817_v41 = vmul.f32 %v2143_v32, %v1816_v38 }
0x1457   :  { %v1818_v44 = vadd.f32 %v2143_v32, %v1817_v41 }
0x1459   :  { %v1822_v47 = vsel %vm1821_vm14, %v2143_v32, %v1818_v44 }
0x145a   :  { %v1827_v60 = vsel %vm1824_vm15, %v1826_v46, %v1822_v47 }
0x145b   :  { %1830 = vst [vmem:[#allocation2 + $0x8] sm:$0xff] %v1827_v60 }
0x145c   :  { %1843 = dma.vmem_to_hbm [thread:$0]  %s1836_s21, 256, %s1838_s9, [#allocation3], %s2187_s24, %s2187_s24, %s2188_s26  }
0x145d   :  { %2170 = dma.done.wait [#allocation3], 256  }
0x145e   :  { %2171 = vsyncadd [#allocation3], 4294967040 }
0x145f   :  { %1848 = vsyncpa [#allocation3], 1 }

</bundles_post_ra>
